<compile_context>
chip_gen: v5e
topology: v5e:2x2
jax: 0.10.0
libtpu: 0.0.40
codegen_flags: <defaults>
</compile_context>

<pallas_src>
import jax
import jax.numpy as jnp
from jax import lax
from jax.experimental import pallas as pl
from jax.experimental.pallas import tpu as pltpu

NCLASSES = 10


# ------------------------------ fused kernel ------------------------------- #

def _wdcnn_kernel(
    patches_ref,                        # (1, 257, 128) layer-1 im2col patches
    w_dw1_ref, b_dw1_ref,               # (128, 58), (1, 58)  block-diag depthwise
    w_pw1_ref, b_pw1_ref,               # (58, 14),  (1, 14)
    w_dw2_ref, b_dw2_ref,               # (3, 14),   (1, 14)
    w_pw2_ref, b_pw2_ref,               # (14, 32),  (1, 32)
    w_dw3_ref, b_dw3_ref,               # (2, 32),   (1, 32)
    w_pw3_ref, b_pw3_ref,               # (32, 64),  (1, 64)
    w_dw4_ref, b_dw4_ref,               # (3, 64),   (1, 64)
    w_pw4_ref, b_pw4_ref,               # (64, 64),  (1, 64)
    w_dw5_ref, b_dw5_ref,               # (3, 64),   (1, 64)
    w_pw5_ref, b_pw5_ref,               # (64, 64),  (1, 64)
    w_fc1a_ref, w_fc1b_ref, b_fc1_ref,  # (64, 100), (64, 100), (1, 100)
    w_fc2_ref, b_fc2_ref,               # (100, 10), (1, 10)
    out_ref,                            # (1, 1, 10)
    pad_ref,                            # VMEM scratch shared by layers 2..5
):
    f32 = jnp.float32

    def maxpool(y, p):
        # MaxPool1d(kernel_size=p, stride=p) along the sublane (length) axis.
        L, _ = y.shape
        Lm = L - p + 1
        m = y[0:Lm, :]
        for j in range(1, p):
            m = jnp.maximum(m, y[j:j + Lm, :])
        Lo = L // p
        # Exact 0/1 selection matmul picks rows 0, p, 2p, ... (no strided
        # slices, no sublane-splitting reshapes).
        r = lax.broadcasted_iota(jnp.int32, (Lo, Lm), 0)
        c = lax.broadcasted_iota(jnp.int32, (Lo, Lm), 1)
        sel = (c == r * p).astype(f32)
        return jnp.dot(sel, m, preferred_element_type=f32)

    def sep_conv(x, w_dw_ref, b_dw_ref, w_pw_ref, b_pw_ref, ksize):
        # Depthwise (groups=C, depth_mult=1, stride=1, pad=ksize//2) +
        # pointwise 1x1 conv + ReLU, in (L, C) layout.
        L, C = x.shape
        pad = ksize // 2
        Lo = L + 2 * pad - ksize + 1
        pad_ref[...] = jnp.zeros(pad_ref.shape, f32)
        pad_ref[pad:pad + L, 0:C] = x
        acc = jnp.zeros((Lo, C), f32)
        for k in range(ksize):                     # K <= 3, fully unrolled
            acc = acc + pad_ref[k:k + Lo, 0:C] * w_dw_ref[k:k + 1, :]
        acc = acc + b_dw_ref[...]
        y = jnp.dot(acc, w_pw_ref[...], preferred_element_type=f32) + b_pw_ref[...]
        return jnp.maximum(y, 0.0)

    # ---- layer 1: grouped depthwise (K=64, stride=8) as block-diag matmul ----
    p1 = patches_ref[0]                                               # (257, 128)
    h = jnp.dot(p1, w_dw1_ref[...], preferred_element_type=f32) + b_dw1_ref[...]
    h = jnp.dot(h, w_pw1_ref[...], preferred_element_type=f32) + b_pw1_ref[...]
    a = maxpool(jnp.maximum(h, 0.0), 3)                               # (85, 14)

    # ---- layers 2..5 ----
    a = maxpool(sep_conv(a, w_dw2_ref, b_dw2_ref, w_pw2_ref, b_pw2_ref, 3), 3)  # (28, 32)
    a = maxpool(sep_conv(a, w_dw3_ref, b_dw3_ref, w_pw3_ref, b_pw3_ref, 2), 3)  # (9, 64)
    a = maxpool(sep_conv(a, w_dw4_ref, b_dw4_ref, w_pw4_ref, b_pw4_ref, 3), 2)  # (4, 64)
    a = maxpool(sep_conv(a, w_dw5_ref, b_dw5_ref, w_pw5_ref, b_pw5_ref, 3), 2)  # (2, 64)

    # ---- head: Flatten -> Linear(128,100) -> Sigmoid -> Linear(100,10) -> Softmax
    # Flatten permutation (feature index = channel*2 + t) is folded into the
    # pre-split fc1 weights, so no in-kernel reshape/transpose is needed.
    y = (jnp.dot(a[0:1, :], w_fc1a_ref[...], preferred_element_type=f32)
         + jnp.dot(a[1:2, :], w_fc1b_ref[...], preferred_element_type=f32)
         + b_fc1_ref[...])                                            # (1, 100)
    s = jax.nn.sigmoid(y)
    # TODO(synk): Dropout(p=0.5) training-mode stochastic mask not implemented
    # (identity at inference).
    logits = jnp.dot(s, w_fc2_ref[...], preferred_element_type=f32) + b_fc2_ref[...]
    logits = logits - jnp.max(logits, axis=-1, keepdims=True)
    e = jnp.exp(logits)
    out_ref[0] = e / jnp.sum(e, axis=-1, keepdims=True)               # softmax


# ------------------------------- JAX wrapper -------------------------------- #

def _out_len(L):
    l = L // 8 + 1      # sep-conv1: K=64, stride=8, pad=32 (needs L % 8 == 0)
    l = l // 3          # maxpool 3
    l = l // 3          # sep-conv2 (same length), maxpool 3
    l = (l + 1) // 3    # sep-conv3: K=2, pad=1 grows length by 1; maxpool 3
    l = l // 2          # sep-conv4 (same length), maxpool 2
    l = l // 2          # sep-conv5 (same length), maxpool 2
    return l


def wdcnn_forward(x, params):
    B, Cin, L = x.shape
    assert Cin == 2 and L % 8 == 0 and _out_len(L) == 2, (
        "nn.Linear(128, 100) requires the conv stack to end with 64 ch x 2 "
        "steps (e.g. L = 2048).")

    # ---- layer-1 im2col via pad + reshape + shifted slices (no gather) ----
    K1, S1, P1 = 64, 8, 32
    xp = jnp.pad(x, ((0, 0), (0, 0), (P1, P1)))                 # (B, 2, L+64)
    Lpad = L + 2 * P1
    Lo1 = (Lpad - K1) // S1 + 1                                 # L//8 + 1
    x3 = xp.reshape(B, Cin, Lpad // S1, S1)                     # (B, 2, Lpad/8, 8)
    windows = [x3[:, :, q:q + Lo1, :] for q in range(K1 // S1)]
    patches = jnp.concatenate(windows, axis=-1)                 # (B, 2, Lo1, 64)
    patches = patches.transpose(0, 2, 1, 3).reshape(B, Lo1, Cin * K1)  # (B,Lo1,128)

    # ---- reshape weights to kernel-friendly layouts (tiny, trace-time) ----
    dm = 29
    w_g0 = params["dw1_w"][0:dm, 0, :].T                        # (64, 29)
    w_g1 = params["dw1_w"][dm:2 * dm, 0, :].T                   # (64, 29)
    z29 = jnp.zeros((K1, dm), jnp.float32)
    w_dw1 = jnp.concatenate(                                    # (128, 58) block-diag
        [jnp.concatenate([w_g0, z29], axis=1),
         jnp.concatenate([z29, w_g1], axis=1)], axis=0)

    def row(b):
        return b.reshape(1, -1)

    fc1_t = params["fc1_w"].T                                   # (128, 100), row = c*2+t

    operands = [
        patches,
        w_dw1, row(params["dw1_b"]),
        params["pw1_w"][:, :, 0].T, row(params["pw1_b"]),
        params["dw2_w"][:, 0, :].T, row(params["dw2_b"]),
        params["pw2_w"][:, :, 0].T, row(params["pw2_b"]),
        params["dw3_w"][:, 0, :].T, row(params["dw3_b"]),
        params["pw3_w"][:, :, 0].T, row(params["pw3_b"]),
        params["dw4_w"][:, 0, :].T, row(params["dw4_b"]),
        params["pw4_w"][:, :, 0].T, row(params["pw4_b"]),
        params["dw5_w"][:, 0, :].T, row(params["dw5_b"]),
        params["pw5_w"][:, :, 0].T, row(params["pw5_b"]),
        fc1_t[0::2, :], fc1_t[1::2, :], row(params["fc1_b"]),
        params["fc2_w"].T, row(params["fc2_b"]),
    ]

    in_specs = [pl.BlockSpec((1, Lo1, Cin * K1), lambda b: (b, 0, 0))]
    in_specs += [pl.BlockSpec(w.shape, lambda b: (0, 0)) for w in operands[1:]]

    # Shared zero-padded scratch for the layer-2..5 depthwise convs.
    scratch_rows = ((Lo1 // 3 + 2 + 7) // 8) * 8                # 88 for L=2048

    out = pl.pallas_call(
        _wdcnn_kernel,
        out_shape=jax.ShapeDtypeStruct((B, 1, NCLASSES), jnp.float32),
        grid=(B,),
        in_specs=in_specs,
        out_specs=pl.BlockSpec((1, 1, NCLASSES), lambda b: (b, 0, 0)),
        scratch_shapes=[pltpu.VMEM((scratch_rows, 64), jnp.float32)],
        compiler_params=pltpu.CompilerParams(
            dimension_semantics=("parallel",)),
    )(*operands)
    return out[:, 0, :]                                         # (B, 10)


# --------------------------- deterministic params --------------------------- #

def init_params(key):
    keys = list(jax.random.split(key, 24))

    def u(shape, fan_in):
        k = keys.pop(0)
        bound = 1.0 / (float(fan_in) ** 0.5)
        return jax.random.uniform(k, shape, jnp.float32, -bound, bound)

    p = {}
    # SeparableConv1D 1: dw Conv1d(2, 58, 64, stride=8, pad=32, groups=2); pw (58->14)
    p["dw1_w"] = u((58, 1, 64), 64);   p["dw1_b"] = u((58,), 64)
    p["pw1_w"] = u((14, 58, 1), 58);   p["pw1_b"] = u((14,), 58)
    # SeparableConv1D 2: dw (14, K=3, pad=1); pw (14->32)
    p["dw2_w"] = u((14, 1, 3), 3);     p["dw2_b"] = u((14,), 3)
    p["pw2_w"] = u((32, 14, 1), 14);   p["pw2_b"] = u((32,), 14)
    # SeparableConv1D 3: dw (32, K=2, pad=1); pw (32->64)
    p["dw3_w"] = u((32, 1, 2), 2);     p["dw3_b"] = u((32,), 2)
    p["pw3_w"] = u((64, 32, 1), 32);   p["pw3_b"] = u((64,), 32)
    # SeparableConv1D 4: dw (64, K=3, pad=1); pw (64->64)
    p["dw4_w"] = u((64, 1, 3), 3);     p["dw4_b"] = u((64,), 3)
    p["pw4_w"] = u((64, 64, 1), 64);   p["pw4_b"] = u((64,), 64)
    # SeparableConv1D 5: dw (64, K=3, pad=1); pw (64->64)
    p["dw5_w"] = u((64, 1, 3), 3);     p["dw5_b"] = u((64,), 3)
    p["pw5_w"] = u((64, 64, 1), 64);   p["pw5_b"] = u((64,), 64)
    # Linear(128, 100), Linear(100, 10)
    p["fc1_w"] = u((100, 128), 128);   p["fc1_b"] = u((100,), 128)
    p["fc2_w"] = u((NCLASSES, 100), 100); p["fc2_b"] = u((NCLASSES,), 100)
    return p


if __name__ == "__main__":
    key = jax.random.PRNGKey(0)
    kp, kx = jax.random.split(key)
    params = init_params(kp)

    # L=2048 is what nn.Linear(128, 100) implies (64 channels x 2 time steps).
    B, C, L = 2, 2, 2048
    x = jax.random.normal(kx, (B, C, L), jnp.float32)

    out = jax.jit(wdcnn_forward)(x, params)
    out = jax.block_until_ready(out)
    assert out.shape == (B, NCLASSES), out.shape
    print("KERNEL_OK")
</pallas_src>

<mosaic_0001>
module attributes {stable_mosaic.version = 11 : i64} {
  func.func @_wdcnn_kernel(%arg0: i32, %arg1: memref<1x257x128xf32, #tpu.memory_space<vmem>>, %arg2: memref<128x58xf32, #tpu.memory_space<vmem>>, %arg3: memref<1x58xf32, #tpu.memory_space<vmem>>, %arg4: memref<58x14xf32, #tpu.memory_space<vmem>>, %arg5: memref<1x14xf32, #tpu.memory_space<vmem>>, %arg6: memref<3x14xf32, #tpu.memory_space<vmem>>, %arg7: memref<1x14xf32, #tpu.memory_space<vmem>>, %arg8: memref<14x32xf32, #tpu.memory_space<vmem>>, %arg9: memref<1x32xf32, #tpu.memory_space<vmem>>, %arg10: memref<2x32xf32, #tpu.memory_space<vmem>>, %arg11: memref<1x32xf32, #tpu.memory_space<vmem>>, %arg12: memref<32x64xf32, #tpu.memory_space<vmem>>, %arg13: memref<1x64xf32, #tpu.memory_space<vmem>>, %arg14: memref<3x64xf32, #tpu.memory_space<vmem>>, %arg15: memref<1x64xf32, #tpu.memory_space<vmem>>, %arg16: memref<64x64xf32, #tpu.memory_space<vmem>>, %arg17: memref<1x64xf32, #tpu.memory_space<vmem>>, %arg18: memref<3x64xf32, #tpu.memory_space<vmem>>, %arg19: memref<1x64xf32, #tpu.memory_space<vmem>>, %arg20: memref<64x64xf32, #tpu.memory_space<vmem>>, %arg21: memref<1x64xf32, #tpu.memory_space<vmem>>, %arg22: memref<64x100xf32, #tpu.memory_space<vmem>>, %arg23: memref<64x100xf32, #tpu.memory_space<vmem>>, %arg24: memref<1x100xf32, #tpu.memory_space<vmem>>, %arg25: memref<100x10xf32, #tpu.memory_space<vmem>>, %arg26: memref<1x10xf32, #tpu.memory_space<vmem>>, %arg27: memref<1x1x10xf32, #tpu.memory_space<vmem>>, %arg28: memref<88x64xf32, #tpu.memory_space<vmem>>) attributes {dimension_semantics = [#tpu.dimension_semantics<parallel>], iteration_bounds = array<i64: 2>, scalar_prefetch = 0 : i64, scratch_operands = 1 : i64, tpu.core_type = #tpu.core_type<tc>, window_params = [{transform_indices = @transform_0, window_bounds = array<i64: 1, 257, 128>}, {pipeline_mode = #tpu.pipeline_mode<synchronous>, transform_indices = @transform_1, window_bounds = array<i64: 128, 58>}, {pipeline_mode = #tpu.pipeline_mode<synchronous>, transform_indices = @transform_2, window_bounds = array<i64: 1, 58>}, {pipeline_mode = #tpu.pipeline_mode<synchronous>, transform_indices = @transform_3, window_bounds = array<i64: 58, 14>}, {pipeline_mode = #tpu.pipeline_mode<synchronous>, transform_indices = @transform_4, window_bounds = array<i64: 1, 14>}, {pipeline_mode = #tpu.pipeline_mode<synchronous>, transform_indices = @transform_5, window_bounds = array<i64: 3, 14>}, {pipeline_mode = #tpu.pipeline_mode<synchronous>, transform_indices = @transform_6, window_bounds = array<i64: 1, 14>}, {pipeline_mode = #tpu.pipeline_mode<synchronous>, transform_indices = @transform_7, window_bounds = array<i64: 14, 32>}, {pipeline_mode = #tpu.pipeline_mode<synchronous>, transform_indices = @transform_8, window_bounds = array<i64: 1, 32>}, {pipeline_mode = #tpu.pipeline_mode<synchronous>, transform_indices = @transform_9, window_bounds = array<i64: 2, 32>}, {pipeline_mode = #tpu.pipeline_mode<synchronous>, transform_indices = @transform_10, window_bounds = array<i64: 1, 32>}, {pipeline_mode = #tpu.pipeline_mode<synchronous>, transform_indices = @transform_11, window_bounds = array<i64: 32, 64>}, {pipeline_mode = #tpu.pipeline_mode<synchronous>, transform_indices = @transform_12, window_bounds = array<i64: 1, 64>}, {pipeline_mode = #tpu.pipeline_mode<synchronous>, transform_indices = @transform_13, window_bounds = array<i64: 3, 64>}, {pipeline_mode = #tpu.pipeline_mode<synchronous>, transform_indices = @transform_14, window_bounds = array<i64: 1, 64>}, {pipeline_mode = #tpu.pipeline_mode<synchronous>, transform_indices = @transform_15, window_bounds = array<i64: 64, 64>}, {pipeline_mode = #tpu.pipeline_mode<synchronous>, transform_indices = @transform_16, window_bounds = array<i64: 1, 64>}, {pipeline_mode = #tpu.pipeline_mode<synchronous>, transform_indices = @transform_17, window_bounds = array<i64: 3, 64>}, {pipeline_mode = #tpu.pipeline_mode<synchronous>, transform_indices = @transform_18, window_bounds = array<i64: 1, 64>}, {pipeline_mode = #tpu.pipeline_mode<synchronous>, transform_indices = @transform_19, window_bounds = array<i64: 64, 64>}, {pipeline_mode = #tpu.pipeline_mode<synchronous>, transform_indices = @transform_20, window_bounds = array<i64: 1, 64>}, {pipeline_mode = #tpu.pipeline_mode<synchronous>, transform_indices = @transform_21, window_bounds = array<i64: 64, 100>}, {pipeline_mode = #tpu.pipeline_mode<synchronous>, transform_indices = @transform_22, window_bounds = array<i64: 64, 100>}, {pipeline_mode = #tpu.pipeline_mode<synchronous>, transform_indices = @transform_23, window_bounds = array<i64: 1, 100>}, {pipeline_mode = #tpu.pipeline_mode<synchronous>, transform_indices = @transform_24, window_bounds = array<i64: 100, 10>}, {pipeline_mode = #tpu.pipeline_mode<synchronous>, transform_indices = @transform_25, window_bounds = array<i64: 1, 10>}, {transform_indices = @transform_26, window_bounds = array<i64: 1, 1, 10>}]} {
    %c0 = arith.constant 0 : index
    %c0_0 = arith.constant 0 : index
    %c0_1 = arith.constant 0 : index
    %0 = vector.load %arg1[%c0, %c0_0, %c0_1] : memref<1x257x128xf32, #tpu.memory_space<vmem>>, vector<1x257x128xf32>
    %1 = vector.shape_cast %0 : vector<1x257x128xf32> to vector<257x128xf32>
    %c0_2 = arith.constant 0 : index
    %c0_3 = arith.constant 0 : index
    %2 = vector.load %arg2[%c0_2, %c0_3] : memref<128x58xf32, #tpu.memory_space<vmem>>, vector<128x58xf32>
    %cst = arith.constant dense<0.000000e+00> : vector<257x58xf32>
    %3 = tpu.matmul %1, %2, %cst {dimension_numbers = #tpu.dot_dimension_numbers<[1], [0], [0], [1], [0, 0, 1, 1], [], []>} : vector<257x128xf32>, vector<128x58xf32>, vector<257x58xf32> -> vector<257x58xf32>
    %c0_4 = arith.constant 0 : index
    %c0_5 = arith.constant 0 : index
    %4 = vector.load %arg3[%c0_4, %c0_5] : memref<1x58xf32, #tpu.memory_space<vmem>>, vector<1x58xf32>
    %5 = vector.broadcast %4 : vector<1x58xf32> to vector<257x58xf32>
    %6 = arith.addf %3, %5 : vector<257x58xf32>
    %c0_6 = arith.constant 0 : index
    %c0_7 = arith.constant 0 : index
    %7 = vector.load %arg4[%c0_6, %c0_7] : memref<58x14xf32, #tpu.memory_space<vmem>>, vector<58x14xf32>
    %cst_8 = arith.constant dense<0.000000e+00> : vector<257x14xf32>
    %8 = tpu.matmul %6, %7, %cst_8 {dimension_numbers = #tpu.dot_dimension_numbers<[1], [0], [0], [1], [0, 0, 1, 1], [], []>} : vector<257x58xf32>, vector<58x14xf32>, vector<257x14xf32> -> vector<257x14xf32>
    %c0_9 = arith.constant 0 : index
    %c0_10 = arith.constant 0 : index
    %9 = vector.load %arg5[%c0_9, %c0_10] : memref<1x14xf32, #tpu.memory_space<vmem>>, vector<1x14xf32>
    %10 = vector.broadcast %9 : vector<1x14xf32> to vector<257x14xf32>
    %11 = arith.addf %8, %10 : vector<257x14xf32>
    %cst_11 = arith.constant 0.000000e+00 : f32
    %12 = vector.broadcast %cst_11 : f32 to vector<257x14xf32>
    %13 = arith.maximumf %11, %12 : vector<257x14xf32>
    %14 = vector.extract_strided_slice %13 {offsets = [0, 0], sizes = [255, 14], strides = [1, 1]} : vector<257x14xf32> to vector<255x14xf32>
    %15 = vector.extract_strided_slice %13 {offsets = [1, 0], sizes = [255, 14], strides = [1, 1]} : vector<257x14xf32> to vector<255x14xf32>
    %16 = arith.maximumf %14, %15 : vector<255x14xf32>
    %17 = vector.extract_strided_slice %13 {offsets = [2, 0], sizes = [255, 14], strides = [1, 1]} : vector<257x14xf32> to vector<255x14xf32>
    %18 = arith.maximumf %16, %17 : vector<255x14xf32>
    %19 = tpu.iota {dimensions = array<i32: 0>} : vector<85x255xi32>
    %20 = tpu.iota {dimensions = array<i32: 1>} : vector<85x255xi32>
    %c3_i32 = arith.constant 3 : i32
    %21 = vector.broadcast %c3_i32 : i32 to vector<85x255xi32>
    %22 = arith.muli %19, %21 : vector<85x255xi32>
    %23 = arith.cmpi eq, %20, %22 : vector<85x255xi32>
    %24 = arith.extui %23 : vector<85x255xi1> to vector<85x255xi32>
    %25 = arith.sitofp %24 : vector<85x255xi32> to vector<85x255xf32>
    %cst_12 = arith.constant dense<0.000000e+00> : vector<85x14xf32>
    %26 = tpu.matmul %25, %18, %cst_12 {dimension_numbers = #tpu.dot_dimension_numbers<[1], [0], [0], [1], [0, 0, 1, 1], [], []>} : vector<85x255xf32>, vector<255x14xf32>, vector<85x14xf32> -> vector<85x14xf32>
    %cst_13 = arith.constant 0.000000e+00 : f32
    %27 = vector.broadcast %cst_13 : f32 to vector<88x64xf32>
    %c0_14 = arith.constant 0 : index
    %c0_15 = arith.constant 0 : index
    %28 = vector.load %arg28[%c0_14, %c0_15] : memref<88x64xf32, #tpu.memory_space<vmem>>, vector<88x64xf32>
    tpu.vector_store %arg28[%c0_14, %c0_15], %27 {strides = array<i32>} : memref<88x64xf32, #tpu.memory_space<vmem>>, vector<88x64xf32>,
    %c1 = arith.constant 1 : index
    %c0_16 = arith.constant 0 : index
    %29 = vector.load %arg28[%c1, %c0_16] : memref<88x64xf32, #tpu.memory_space<vmem>>, vector<85x14xf32>
    tpu.vector_store %arg28[%c1, %c0_16], %26 {strides = array<i32>} : memref<88x64xf32, #tpu.memory_space<vmem>>, vector<85x14xf32>,
    %cst_17 = arith.constant 0.000000e+00 : f32
    %30 = vector.broadcast %cst_17 : f32 to vector<85x14xf32>
    %c0_18 = arith.constant 0 : index
    %c0_19 = arith.constant 0 : index
    %31 = vector.load %arg28[%c0_18, %c0_19] : memref<88x64xf32, #tpu.memory_space<vmem>>, vector<85x14xf32>
    %c0_20 = arith.constant 0 : index
    %c0_21 = arith.constant 0 : index
    %32 = vector.load %arg6[%c0_20, %c0_21] : memref<3x14xf32, #tpu.memory_space<vmem>>, vector<1x14xf32>
    %33 = vector.broadcast %32 : vector<1x14xf32> to vector<85x14xf32>
    %34 = arith.mulf %31, %33 : vector<85x14xf32>
    %35 = arith.addf %30, %34 : vector<85x14xf32>
    %c1_22 = arith.constant 1 : index
    %c0_23 = arith.constant 0 : index
    %36 = vector.load %arg28[%c1_22, %c0_23] : memref<88x64xf32, #tpu.memory_space<vmem>>, vector<85x14xf32>
    %c1_24 = arith.constant 1 : index
    %c0_25 = arith.constant 0 : index
    %37 = vector.load %arg6[%c1_24, %c0_25] : memref<3x14xf32, #tpu.memory_space<vmem>>, vector<1x14xf32>
    %38 = vector.broadcast %37 : vector<1x14xf32> to vector<85x14xf32>
    %39 = arith.mulf %36, %38 : vector<85x14xf32>
    %40 = arith.addf %35, %39 : vector<85x14xf32>
    %c2 = arith.constant 2 : index
    %c0_26 = arith.constant 0 : index
    %41 = vector.load %arg28[%c2, %c0_26] : memref<88x64xf32, #tpu.memory_space<vmem>>, vector<85x14xf32>
    %c2_27 = arith.constant 2 : index
    %c0_28 = arith.constant 0 : index
    %42 = vector.load %arg6[%c2_27, %c0_28] : memref<3x14xf32, #tpu.memory_space<vmem>>, vector<1x14xf32>
    %43 = vector.broadcast %42 : vector<1x14xf32> to vector<85x14xf32>
    %44 = arith.mulf %41, %43 : vector<85x14xf32>
    %45 = arith.addf %40, %44 : vector<85x14xf32>
    %c0_29 = arith.constant 0 : index
    %c0_30 = arith.constant 0 : index
    %46 = vector.load %arg7[%c0_29, %c0_30] : memref<1x14xf32, #tpu.memory_space<vmem>>, vector<1x14xf32>
    %47 = vector.broadcast %46 : vector<1x14xf32> to vector<85x14xf32>
    %48 = arith.addf %45, %47 : vector<85x14xf32>
    %c0_31 = arith.constant 0 : index
    %c0_32 = arith.constant 0 : index
    %49 = vector.load %arg8[%c0_31, %c0_32] : memref<14x32xf32, #tpu.memory_space<vmem>>, vector<14x32xf32>
    %cst_33 = arith.constant dense<0.000000e+00> : vector<85x32xf32>
    %50 = tpu.matmul %48, %49, %cst_33 {dimension_numbers = #tpu.dot_dimension_numbers<[1], [0], [0], [1], [0, 0, 1, 1], [], []>} : vector<85x14xf32>, vector<14x32xf32>, vector<85x32xf32> -> vector<85x32xf32>
    %c0_34 = arith.constant 0 : index
    %c0_35 = arith.constant 0 : index
    %51 = vector.load %arg9[%c0_34, %c0_35] : memref<1x32xf32, #tpu.memory_space<vmem>>, vector<1x32xf32>
    %52 = vector.broadcast %51 : vector<1x32xf32> to vector<85x32xf32>
    %53 = arith.addf %50, %52 : vector<85x32xf32>
    %cst_36 = arith.constant 0.000000e+00 : f32
    %54 = vector.broadcast %cst_36 : f32 to vector<85x32xf32>
    %55 = arith.maximumf %53, %54 : vector<85x32xf32>
    %56 = vector.extract_strided_slice %55 {offsets = [0, 0], sizes = [83, 32], strides = [1, 1]} : vector<85x32xf32> to vector<83x32xf32>
    %57 = vector.extract_strided_slice %55 {offsets = [1, 0], sizes = [83, 32], strides = [1, 1]} : vector<85x32xf32> to vector<83x32xf32>
    %58 = arith.maximumf %56, %57 : vector<83x32xf32>
    %59 = vector.extract_strided_slice %55 {offsets = [2, 0], sizes = [83, 32], strides = [1, 1]} : vector<85x32xf32> to vector<83x32xf32>
    %60 = arith.maximumf %58, %59 : vector<83x32xf32>
    %61 = tpu.iota {dimensions = array<i32: 0>} : vector<28x83xi32>
    %62 = tpu.iota {dimensions = array<i32: 1>} : vector<28x83xi32>
    %c3_i32_37 = arith.constant 3 : i32
    %63 = vector.broadcast %c3_i32_37 : i32 to vector<28x83xi32>
    %64 = arith.muli %61, %63 : vector<28x83xi32>
    %65 = arith.cmpi eq, %62, %64 : vector<28x83xi32>
    %66 = arith.extui %65 : vector<28x83xi1> to vector<28x83xi32>
    %67 = arith.sitofp %66 : vector<28x83xi32> to vector<28x83xf32>
    %cst_38 = arith.constant dense<0.000000e+00> : vector<28x32xf32>
    %68 = tpu.matmul %67, %60, %cst_38 {dimension_numbers = #tpu.dot_dimension_numbers<[1], [0], [0], [1], [0, 0, 1, 1], [], []>} : vector<28x83xf32>, vector<83x32xf32>, vector<28x32xf32> -> vector<28x32xf32>
    %cst_39 = arith.constant 0.000000e+00 : f32
    %69 = vector.broadcast %cst_39 : f32 to vector<88x64xf32>
    %c0_40 = arith.constant 0 : index
    %c0_41 = arith.constant 0 : index
    %70 = vector.load %arg28[%c0_40, %c0_41] : memref<88x64xf32, #tpu.memory_space<vmem>>, vector<88x64xf32>
    tpu.vector_store %arg28[%c0_40, %c0_41], %69 {strides = array<i32>} : memref<88x64xf32, #tpu.memory_space<vmem>>, vector<88x64xf32>,
    %c1_42 = arith.constant 1 : index
    %c0_43 = arith.constant 0 : index
    %71 = vector.load %arg28[%c1_42, %c0_43] : memref<88x64xf32, #tpu.memory_space<vmem>>, vector<28x32xf32>
    tpu.vector_store %arg28[%c1_42, %c0_43], %68 {strides = array<i32>} : memref<88x64xf32, #tpu.memory_space<vmem>>, vector<28x32xf32>,
    %cst_44 = arith.constant 0.000000e+00 : f32
    %72 = vector.broadcast %cst_44 : f32 to vector<29x32xf32>
    %c0_45 = arith.constant 0 : index
    %c0_46 = arith.constant 0 : index
    %73 = vector.load %arg28[%c0_45, %c0_46] : memref<88x64xf32, #tpu.memory_space<vmem>>, vector<29x32xf32>
    %c0_47 = arith.constant 0 : index
    %c0_48 = arith.constant 0 : index
    %74 = vector.load %arg10[%c0_47, %c0_48] : memref<2x32xf32, #tpu.memory_space<vmem>>, vector<1x32xf32>
    %75 = vector.broadcast %74 : vector<1x32xf32> to vector<29x32xf32>
    %76 = arith.mulf %73, %75 : vector<29x32xf32>
    %77 = arith.addf %72, %76 : vector<29x32xf32>
    %c1_49 = arith.constant 1 : index
    %c0_50 = arith.constant 0 : index
    %78 = vector.load %arg28[%c1_49, %c0_50] : memref<88x64xf32, #tpu.memory_space<vmem>>, vector<29x32xf32>
    %c1_51 = arith.constant 1 : index
    %c0_52 = arith.constant 0 : index
    %79 = vector.load %arg10[%c1_51, %c0_52] : memref<2x32xf32, #tpu.memory_space<vmem>>, vector<1x32xf32>
    %80 = vector.broadcast %79 : vector<1x32xf32> to vector<29x32xf32>
    %81 = arith.mulf %78, %80 : vector<29x32xf32>
    %82 = arith.addf %77, %81 : vector<29x32xf32>
    %c0_53 = arith.constant 0 : index
    %c0_54 = arith.constant 0 : index
    %83 = vector.load %arg11[%c0_53, %c0_54] : memref<1x32xf32, #tpu.memory_space<vmem>>, vector<1x32xf32>
    %84 = vector.broadcast %83 : vector<1x32xf32> to vector<29x32xf32>
    %85 = arith.addf %82, %84 : vector<29x32xf32>
    %c0_55 = arith.constant 0 : index
    %c0_56 = arith.constant 0 : index
    %86 = vector.load %arg12[%c0_55, %c0_56] : memref<32x64xf32, #tpu.memory_space<vmem>>, vector<32x64xf32>
    %cst_57 = arith.constant dense<0.000000e+00> : vector<29x64xf32>
    %87 = tpu.matmul %85, %86, %cst_57 {dimension_numbers = #tpu.dot_dimension_numbers<[1], [0], [0], [1], [0, 0, 1, 1], [], []>} : vector<29x32xf32>, vector<32x64xf32>, vector<29x64xf32> -> vector<29x64xf32>
    %c0_58 = arith.constant 0 : index
    %c0_59 = arith.constant 0 : index
    %88 = vector.load %arg13[%c0_58, %c0_59] : memref<1x64xf32, #tpu.memory_space<vmem>>, vector<1x64xf32>
    %89 = vector.broadcast %88 : vector<1x64xf32> to vector<29x64xf32>
    %90 = arith.addf %87, %89 : vector<29x64xf32>
    %cst_60 = arith.constant 0.000000e+00 : f32
    %91 = vector.broadcast %cst_60 : f32 to vector<29x64xf32>
    %92 = arith.maximumf %90, %91 : vector<29x64xf32>
    %93 = vector.extract_strided_slice %92 {offsets = [0, 0], sizes = [27, 64], strides = [1, 1]} : vector<29x64xf32> to vector<27x64xf32>
    %94 = vector.extract_strided_slice %92 {offsets = [1, 0], sizes = [27, 64], strides = [1, 1]} : vector<29x64xf32> to vector<27x64xf32>
    %95 = arith.maximumf %93, %94 : vector<27x64xf32>
    %96 = vector.extract_strided_slice %92 {offsets = [2, 0], sizes = [27, 64], strides = [1, 1]} : vector<29x64xf32> to vector<27x64xf32>
    %97 = arith.maximumf %95, %96 : vector<27x64xf32>
    %98 = tpu.iota {dimensions = array<i32: 0>} : vector<9x27xi32>
    %99 = tpu.iota {dimensions = array<i32: 1>} : vector<9x27xi32>
    %c3_i32_61 = arith.constant 3 : i32
    %100 = vector.broadcast %c3_i32_61 : i32 to vector<9x27xi32>
    %101 = arith.muli %98, %100 : vector<9x27xi32>
    %102 = arith.cmpi eq, %99, %101 : vector<9x27xi32>
    %103 = arith.extui %102 : vector<9x27xi1> to vector<9x27xi32>
    %104 = arith.sitofp %103 : vector<9x27xi32> to vector<9x27xf32>
    %cst_62 = arith.constant dense<0.000000e+00> : vector<9x64xf32>
    %105 = tpu.matmul %104, %97, %cst_62 {dimension_numbers = #tpu.dot_dimension_numbers<[1], [0], [0], [1], [0, 0, 1, 1], [], []>} : vector<9x27xf32>, vector<27x64xf32>, vector<9x64xf32> -> vector<9x64xf32>
    %cst_63 = arith.constant 0.000000e+00 : f32
    %106 = vector.broadcast %cst_63 : f32 to vector<88x64xf32>
    %c0_64 = arith.constant 0 : index
    %c0_65 = arith.constant 0 : index
    %107 = vector.load %arg28[%c0_64, %c0_65] : memref<88x64xf32, #tpu.memory_space<vmem>>, vector<88x64xf32>
    tpu.vector_store %arg28[%c0_64, %c0_65], %106 {strides = array<i32>} : memref<88x64xf32, #tpu.memory_space<vmem>>, vector<88x64xf32>,
    %c1_66 = arith.constant 1 : index
    %c0_67 = arith.constant 0 : index
    %108 = vector.load %arg28[%c1_66, %c0_67] : memref<88x64xf32, #tpu.memory_space<vmem>>, vector<9x64xf32>
    tpu.vector_store %arg28[%c1_66, %c0_67], %105 {strides = array<i32>} : memref<88x64xf32, #tpu.memory_space<vmem>>, vector<9x64xf32>,
    %cst_68 = arith.constant 0.000000e+00 : f32
    %109 = vector.broadcast %cst_68 : f32 to vector<9x64xf32>
    %c0_69 = arith.constant 0 : index
    %c0_70 = arith.constant 0 : index
    %110 = vector.load %arg28[%c0_69, %c0_70] : memref<88x64xf32, #tpu.memory_space<vmem>>, vector<9x64xf32>
    %c0_71 = arith.constant 0 : index
    %c0_72 = arith.constant 0 : index
    %111 = vector.load %arg14[%c0_71, %c0_72] : memref<3x64xf32, #tpu.memory_space<vmem>>, vector<1x64xf32>
    %112 = vector.broadcast %111 : vector<1x64xf32> to vector<9x64xf32>
    %113 = arith.mulf %110, %112 : vector<9x64xf32>
    %114 = arith.addf %109, %113 : vector<9x64xf32>
    %c1_73 = arith.constant 1 : index
    %c0_74 = arith.constant 0 : index
    %115 = vector.load %arg28[%c1_73, %c0_74] : memref<88x64xf32, #tpu.memory_space<vmem>>, vector<9x64xf32>
    %c1_75 = arith.constant 1 : index
    %c0_76 = arith.constant 0 : index
    %116 = vector.load %arg14[%c1_75, %c0_76] : memref<3x64xf32, #tpu.memory_space<vmem>>, vector<1x64xf32>
    %117 = vector.broadcast %116 : vector<1x64xf32> to vector<9x64xf32>
    %118 = arith.mulf %115, %117 : vector<9x64xf32>
    %119 = arith.addf %114, %118 : vector<9x64xf32>
    %c2_77 = arith.constant 2 : index
    %c0_78 = arith.constant 0 : index
    %120 = vector.load %arg28[%c2_77, %c0_78] : memref<88x64xf32, #tpu.memory_space<vmem>>, vector<9x64xf32>
    %c2_79 = arith.constant 2 : index
    %c0_80 = arith.constant 0 : index
    %121 = vector.load %arg14[%c2_79, %c0_80] : memref<3x64xf32, #tpu.memory_space<vmem>>, vector<1x64xf32>
    %122 = vector.broadcast %121 : vector<1x64xf32> to vector<9x64xf32>
    %123 = arith.mulf %120, %122 : vector<9x64xf32>
    %124 = arith.addf %119, %123 : vector<9x64xf32>
    %c0_81 = arith.constant 0 : index
    %c0_82 = arith.constant 0 : index
    %125 = vector.load %arg15[%c0_81, %c0_82] : memref<1x64xf32, #tpu.memory_space<vmem>>, vector<1x64xf32>
    %126 = vector.broadcast %125 : vector<1x64xf32> to vector<9x64xf32>
    %127 = arith.addf %124, %126 : vector<9x64xf32>
    %c0_83 = arith.constant 0 : index
    %c0_84 = arith.constant 0 : index
    %128 = vector.load %arg16[%c0_83, %c0_84] : memref<64x64xf32, #tpu.memory_space<vmem>>, vector<64x64xf32>
    %cst_85 = arith.constant dense<0.000000e+00> : vector<9x64xf32>
    %129 = tpu.matmul %127, %128, %cst_85 {dimension_numbers = #tpu.dot_dimension_numbers<[1], [0], [0], [1], [0, 0, 1, 1], [], []>} : vector<9x64xf32>, vector<64x64xf32>, vector<9x64xf32> -> vector<9x64xf32>
    %c0_86 = arith.constant 0 : index
    %c0_87 = arith.constant 0 : index
    %130 = vector.load %arg17[%c0_86, %c0_87] : memref<1x64xf32, #tpu.memory_space<vmem>>, vector<1x64xf32>
    %131 = vector.broadcast %130 : vector<1x64xf32> to vector<9x64xf32>
    %132 = arith.addf %129, %131 : vector<9x64xf32>
    %cst_88 = arith.constant 0.000000e+00 : f32
    %133 = vector.broadcast %cst_88 : f32 to vector<9x64xf32>
    %134 = arith.maximumf %132, %133 : vector<9x64xf32>
    %135 = vector.extract_strided_slice %134 {offsets = [0, 0], sizes = [8, 64], strides = [1, 1]} : vector<9x64xf32> to vector<8x64xf32>
    %136 = vector.extract_strided_slice %134 {offsets = [1, 0], sizes = [8, 64], strides = [1, 1]} : vector<9x64xf32> to vector<8x64xf32>
    %137 = arith.maximumf %135, %136 : vector<8x64xf32>
    %138 = tpu.iota {dimensions = array<i32: 0>} : vector<4x8xi32>
    %139 = tpu.iota {dimensions = array<i32: 1>} : vector<4x8xi32>
    %c2_i32 = arith.constant 2 : i32
    %140 = vector.broadcast %c2_i32 : i32 to vector<4x8xi32>
    %141 = arith.muli %138, %140 : vector<4x8xi32>
    %142 = arith.cmpi eq, %139, %141 : vector<4x8xi32>
    %143 = arith.extui %142 : vector<4x8xi1> to vector<4x8xi32>
    %144 = arith.sitofp %143 : vector<4x8xi32> to vector<4x8xf32>
    %cst_89 = arith.constant dense<0.000000e+00> : vector<4x64xf32>
    %145 = tpu.matmul %144, %137, %cst_89 {dimension_numbers = #tpu.dot_dimension_numbers<[1], [0], [0], [1], [0, 0, 1, 1], [], []>} : vector<4x8xf32>, vector<8x64xf32>, vector<4x64xf32> -> vector<4x64xf32>
    %cst_90 = arith.constant 0.000000e+00 : f32
    %146 = vector.broadcast %cst_90 : f32 to vector<88x64xf32>
    %c0_91 = arith.constant 0 : index
    %c0_92 = arith.constant 0 : index
    %147 = vector.load %arg28[%c0_91, %c0_92] : memref<88x64xf32, #tpu.memory_space<vmem>>, vector<88x64xf32>
    tpu.vector_store %arg28[%c0_91, %c0_92], %146 {strides = array<i32>} : memref<88x64xf32, #tpu.memory_space<vmem>>, vector<88x64xf32>,
    %c1_93 = arith.constant 1 : index
    %c0_94 = arith.constant 0 : index
    %148 = vector.load %arg28[%c1_93, %c0_94] : memref<88x64xf32, #tpu.memory_space<vmem>>, vector<4x64xf32>
    tpu.vector_store %arg28[%c1_93, %c0_94], %145 {strides = array<i32>} : memref<88x64xf32, #tpu.memory_space<vmem>>, vector<4x64xf32>,
    %cst_95 = arith.constant 0.000000e+00 : f32
    %149 = vector.broadcast %cst_95 : f32 to vector<4x64xf32>
    %c0_96 = arith.constant 0 : index
    %c0_97 = arith.constant 0 : index
    %150 = vector.load %arg28[%c0_96, %c0_97] : memref<88x64xf32, #tpu.memory_space<vmem>>, vector<4x64xf32>
    %c0_98 = arith.constant 0 : index
    %c0_99 = arith.constant 0 : index
    %151 = vector.load %arg18[%c0_98, %c0_99] : memref<3x64xf32, #tpu.memory_space<vmem>>, vector<1x64xf32>
    %152 = vector.broadcast %151 : vector<1x64xf32> to vector<4x64xf32>
    %153 = arith.mulf %150, %152 : vector<4x64xf32>
    %154 = arith.addf %149, %153 : vector<4x64xf32>
    %c1_100 = arith.constant 1 : index
    %c0_101 = arith.constant 0 : index
    %155 = vector.load %arg28[%c1_100, %c0_101] : memref<88x64xf32, #tpu.memory_space<vmem>>, vector<4x64xf32>
    %c1_102 = arith.constant 1 : index
    %c0_103 = arith.constant 0 : index
    %156 = vector.load %arg18[%c1_102, %c0_103] : memref<3x64xf32, #tpu.memory_space<vmem>>, vector<1x64xf32>
    %157 = vector.broadcast %156 : vector<1x64xf32> to vector<4x64xf32>
    %158 = arith.mulf %155, %157 : vector<4x64xf32>
    %159 = arith.addf %154, %158 : vector<4x64xf32>
    %c2_104 = arith.constant 2 : index
    %c0_105 = arith.constant 0 : index
    %160 = vector.load %arg28[%c2_104, %c0_105] : memref<88x64xf32, #tpu.memory_space<vmem>>, vector<4x64xf32>
    %c2_106 = arith.constant 2 : index
    %c0_107 = arith.constant 0 : index
    %161 = vector.load %arg18[%c2_106, %c0_107] : memref<3x64xf32, #tpu.memory_space<vmem>>, vector<1x64xf32>
    %162 = vector.broadcast %161 : vector<1x64xf32> to vector<4x64xf32>
    %163 = arith.mulf %160, %162 : vector<4x64xf32>
    %164 = arith.addf %159, %163 : vector<4x64xf32>
    %c0_108 = arith.constant 0 : index
    %c0_109 = arith.constant 0 : index
    %165 = vector.load %arg19[%c0_108, %c0_109] : memref<1x64xf32, #tpu.memory_space<vmem>>, vector<1x64xf32>
    %166 = vector.broadcast %165 : vector<1x64xf32> to vector<4x64xf32>
    %167 = arith.addf %164, %166 : vector<4x64xf32>
    %c0_110 = arith.constant 0 : index
    %c0_111 = arith.constant 0 : index
    %168 = vector.load %arg20[%c0_110, %c0_111] : memref<64x64xf32, #tpu.memory_space<vmem>>, vector<64x64xf32>
    %cst_112 = arith.constant dense<0.000000e+00> : vector<4x64xf32>
    %169 = tpu.matmul %167, %168, %cst_112 {dimension_numbers = #tpu.dot_dimension_numbers<[1], [0], [0], [1], [0, 0, 1, 1], [], []>} : vector<4x64xf32>, vector<64x64xf32>, vector<4x64xf32> -> vector<4x64xf32>
    %c0_113 = arith.constant 0 : index
    %c0_114 = arith.constant 0 : index
    %170 = vector.load %arg21[%c0_113, %c0_114] : memref<1x64xf32, #tpu.memory_space<vmem>>, vector<1x64xf32>
    %171 = vector.broadcast %170 : vector<1x64xf32> to vector<4x64xf32>
    %172 = arith.addf %169, %171 : vector<4x64xf32>
    %cst_115 = arith.constant 0.000000e+00 : f32
    %173 = vector.broadcast %cst_115 : f32 to vector<4x64xf32>
    %174 = arith.maximumf %172, %173 : vector<4x64xf32>
    %175 = vector.extract_strided_slice %174 {offsets = [0, 0], sizes = [3, 64], strides = [1, 1]} : vector<4x64xf32> to vector<3x64xf32>
    %176 = vector.extract_strided_slice %174 {offsets = [1, 0], sizes = [3, 64], strides = [1, 1]} : vector<4x64xf32> to vector<3x64xf32>
    %177 = arith.maximumf %175, %176 : vector<3x64xf32>
    %178 = tpu.iota {dimensions = array<i32: 0>} : vector<2x3xi32>
    %179 = tpu.iota {dimensions = array<i32: 1>} : vector<2x3xi32>
    %c2_i32_116 = arith.constant 2 : i32
    %180 = vector.broadcast %c2_i32_116 : i32 to vector<2x3xi32>
    %181 = arith.muli %178, %180 : vector<2x3xi32>
    %182 = arith.cmpi eq, %179, %181 : vector<2x3xi32>
    %183 = arith.extui %182 : vector<2x3xi1> to vector<2x3xi32>
    %184 = arith.sitofp %183 : vector<2x3xi32> to vector<2x3xf32>
    %cst_117 = arith.constant dense<0.000000e+00> : vector<2x64xf32>
    %185 = tpu.matmul %184, %177, %cst_117 {dimension_numbers = #tpu.dot_dimension_numbers<[1], [0], [0], [1], [0, 0, 1, 1], [], []>} : vector<2x3xf32>, vector<3x64xf32>, vector<2x64xf32> -> vector<2x64xf32>
    %186 = vector.extract_strided_slice %185 {offsets = [0, 0], sizes = [1, 64], strides = [1, 1]} : vector<2x64xf32> to vector<1x64xf32>
    %c0_118 = arith.constant 0 : index
    %c0_119 = arith.constant 0 : index
    %187 = vector.load %arg22[%c0_118, %c0_119] : memref<64x100xf32, #tpu.memory_space<vmem>>, vector<64x100xf32>
    %cst_120 = arith.constant dense<0.000000e+00> : vector<1x100xf32>
    %188 = tpu.matmul %186, %187, %cst_120 {dimension_numbers = #tpu.dot_dimension_numbers<[1], [0], [0], [1], [0, 0, 1, 1], [], []>} : vector<1x64xf32>, vector<64x100xf32>, vector<1x100xf32> -> vector<1x100xf32>
    %189 = vector.extract_strided_slice %185 {offsets = [1, 0], sizes = [1, 64], strides = [1, 1]} : vector<2x64xf32> to vector<1x64xf32>
    %c0_121 = arith.constant 0 : index
    %c0_122 = arith.constant 0 : index
    %190 = vector.load %arg23[%c0_121, %c0_122] : memref<64x100xf32, #tpu.memory_space<vmem>>, vector<64x100xf32>
    %cst_123 = arith.constant dense<0.000000e+00> : vector<1x100xf32>
    %191 = tpu.matmul %189, %190, %cst_123 {dimension_numbers = #tpu.dot_dimension_numbers<[1], [0], [0], [1], [0, 0, 1, 1], [], []>} : vector<1x64xf32>, vector<64x100xf32>, vector<1x100xf32> -> vector<1x100xf32>
    %192 = arith.addf %188, %191 : vector<1x100xf32>
    %c0_124 = arith.constant 0 : index
    %c0_125 = arith.constant 0 : index
    %193 = vector.load %arg24[%c0_124, %c0_125] : memref<1x100xf32, #tpu.memory_space<vmem>>, vector<1x100xf32>
    %194 = arith.addf %192, %193 : vector<1x100xf32>
    %195 = arith.negf %194 : vector<1x100xf32>
    %196 = math.exp %195 : vector<1x100xf32>
    %cst_126 = arith.constant 1.000000e+00 : f32
    %197 = vector.broadcast %cst_126 : f32 to vector<1x100xf32>
    %198 = arith.addf %197, %196 : vector<1x100xf32>
    %199 = arith.divf %197, %198 : vector<1x100xf32>
    %c0_127 = arith.constant 0 : index
    %c0_128 = arith.constant 0 : index
    %200 = vector.load %arg25[%c0_127, %c0_128] : memref<100x10xf32, #tpu.memory_space<vmem>>, vector<100x10xf32>
    %cst_129 = arith.constant dense<0.000000e+00> : vector<1x10xf32>
    %201 = tpu.matmul %199, %200, %cst_129 {dimension_numbers = #tpu.dot_dimension_numbers<[1], [0], [0], [1], [0, 0, 1, 1], [], []>} : vector<1x100xf32>, vector<100x10xf32>, vector<1x10xf32> -> vector<1x10xf32>
    %c0_130 = arith.constant 0 : index
    %c0_131 = arith.constant 0 : index
    %202 = vector.load %arg26[%c0_130, %c0_131] : memref<1x10xf32, #tpu.memory_space<vmem>>, vector<1x10xf32>
    %203 = arith.addf %201, %202 : vector<1x10xf32>
    %cst_132 = arith.constant dense<0xFF800000> : vector<1xf32>
    %204 = vector.multi_reduction <maximumf>, %203, %cst_132 [1] : vector<1x10xf32> to vector<1xf32>
    %205 = vector.shape_cast %204 : vector<1xf32> to vector<1x1xf32>
    %206 = vector.broadcast %205 : vector<1x1xf32> to vector<1x10xf32>
    %207 = arith.subf %203, %206 : vector<1x10xf32>
    %208 = math.exp %207 : vector<1x10xf32>
    %cst_133 = arith.constant dense<0.000000e+00> : vector<1xf32>
    %209 = vector.multi_reduction <add>, %208, %cst_133 [1] : vector<1x10xf32> to vector<1xf32>
    %210 = vector.shape_cast %209 : vector<1xf32> to vector<1x1xf32>
    %211 = vector.broadcast %210 : vector<1x1xf32> to vector<1x10xf32>
    %212 = arith.divf %208, %211 : vector<1x10xf32>
    %c0_134 = arith.constant 0 : index
    %c0_135 = arith.constant 0 : index
    %c0_136 = arith.constant 0 : index
    %213 = vector.load %arg27[%c0_134, %c0_135, %c0_136] : memref<1x1x10xf32, #tpu.memory_space<vmem>>, vector<1x1x10xf32>
    %214 = vector.shape_cast %213 : vector<1x1x10xf32> to vector<1x10xf32>
    %215 = vector.shape_cast %212 : vector<1x10xf32> to vector<1x1x10xf32>
    tpu.vector_store %arg27[%c0_134, %c0_135, %c0_136], %215 {strides = array<i32>} : memref<1x1x10xf32, #tpu.memory_space<vmem>>, vector<1x1x10xf32>,
    return
  }
  func.func @transform_0(%arg0: i32) -> (i32, i32, i32) {
    %c0_i32 = arith.constant 0 : i32
    %c0_i32_0 = arith.constant 0 : i32
    %c0_i32_1 = arith.constant 0 : i32
    return %arg0, %c0_i32, %c0_i32_0 : i32, i32, i32
  }
  func.func @transform_1(%arg0: i32) -> (i32, i32) {
    %c0_i32 = arith.constant 0 : i32
    %c0_i32_0 = arith.constant 0 : i32
    %c0_i32_1 = arith.constant 0 : i32
    return %c0_i32, %c0_i32_0 : i32, i32
  }
  func.func @transform_2(%arg0: i32) -> (i32, i32) {
    %c0_i32 = arith.constant 0 : i32
    %c0_i32_0 = arith.constant 0 : i32
    %c0_i32_1 = arith.constant 0 : i32
    return %c0_i32, %c0_i32_0 : i32, i32
  }
  func.func @transform_3(%arg0: i32) -> (i32, i32) {
    %c0_i32 = arith.constant 0 : i32
    %c0_i32_0 = arith.constant 0 : i32
    %c0_i32_1 = arith.constant 0 : i32
    return %c0_i32, %c0_i32_0 : i32, i32
  }
  func.func @transform_4(%arg0: i32) -> (i32, i32) {
    %c0_i32 = arith.constant 0 : i32
    %c0_i32_0 = arith.constant 0 : i32
    %c0_i32_1 = arith.constant 0 : i32
    return %c0_i32, %c0_i32_0 : i32, i32
  }
  func.func @transform_5(%arg0: i32) -> (i32, i32) {
    %c0_i32 = arith.constant 0 : i32
    %c0_i32_0 = arith.constant 0 : i32
    %c0_i32_1 = arith.constant 0 : i32
    return %c0_i32, %c0_i32_0 : i32, i32
  }
  func.func @transform_6(%arg0: i32) -> (i32, i32) {
    %c0_i32 = arith.constant 0 : i32
    %c0_i32_0 = arith.constant 0 : i32
    %c0_i32_1 = arith.constant 0 : i32
    return %c0_i32, %c0_i32_0 : i32, i32
  }
  func.func @transform_7(%arg0: i32) -> (i32, i32) {
    %c0_i32 = arith.constant 0 : i32
    %c0_i32_0 = arith.constant 0 : i32
    %c0_i32_1 = arith.constant 0 : i32
    return %c0_i32, %c0_i32_0 : i32, i32
  }
  func.func @transform_8(%arg0: i32) -> (i32, i32) {
    %c0_i32 = arith.constant 0 : i32
    %c0_i32_0 = arith.constant 0 : i32
    %c0_i32_1 = arith.constant 0 : i32
    return %c0_i32, %c0_i32_0 : i32, i32
  }
  func.func @transform_9(%arg0: i32) -> (i32, i32) {
    %c0_i32 = arith.constant 0 : i32
    %c0_i32_0 = arith.constant 0 : i32
    %c0_i32_1 = arith.constant 0 : i32
    return %c0_i32, %c0_i32_0 : i32, i32
  }
  func.func @transform_10(%arg0: i32) -> (i32, i32) {
    %c0_i32 = arith.constant 0 : i32
    %c0_i32_0 = arith.constant 0 : i32
    %c0_i32_1 = arith.constant 0 : i32
    return %c0_i32, %c0_i32_0 : i32, i32
  }
  func.func @transform_11(%arg0: i32) -> (i32, i32) {
    %c0_i32 = arith.constant 0 : i32
    %c0_i32_0 = arith.constant 0 : i32
    %c0_i32_1 = arith.constant 0 : i32
    return %c0_i32, %c0_i32_0 : i32, i32
  }
  func.func @transform_12(%arg0: i32) -> (i32, i32) {
    %c0_i32 = arith.constant 0 : i32
    %c0_i32_0 = arith.constant 0 : i32
    %c0_i32_1 = arith.constant 0 : i32
    return %c0_i32, %c0_i32_0 : i32, i32
  }
  func.func @transform_13(%arg0: i32) -> (i32, i32) {
    %c0_i32 = arith.constant 0 : i32
    %c0_i32_0 = arith.constant 0 : i32
    %c0_i32_1 = arith.constant 0 : i32
    return %c0_i32, %c0_i32_0 : i32, i32
  }
  func.func @transform_14(%arg0: i32) -> (i32, i32) {
    %c0_i32 = arith.constant 0 : i32
    %c0_i32_0 = arith.constant 0 : i32
    %c0_i32_1 = arith.constant 0 : i32
    return %c0_i32, %c0_i32_0 : i32, i32
  }
  func.func @transform_15(%arg0: i32) -> (i32, i32) {
    %c0_i32 = arith.constant 0 : i32
    %c0_i32_0 = arith.constant 0 : i32
    %c0_i32_1 = arith.constant 0 : i32
    return %c0_i32, %c0_i32_0 : i32, i32
  }
  func.func @transform_16(%arg0: i32) -> (i32, i32) {
    %c0_i32 = arith.constant 0 : i32
    %c0_i32_0 = arith.constant 0 : i32
    %c0_i32_1 = arith.constant 0 : i32
    return %c0_i32, %c0_i32_0 : i32, i32
  }
  func.func @transform_17(%arg0: i32) -> (i32, i32) {
    %c0_i32 = arith.constant 0 : i32
    %c0_i32_0 = arith.constant 0 : i32
    %c0_i32_1 = arith.constant 0 : i32
    return %c0_i32, %c0_i32_0 : i32, i32
  }
  func.func @transform_18(%arg0: i32) -> (i32, i32) {
    %c0_i32 = arith.constant 0 : i32
    %c0_i32_0 = arith.constant 0 : i32
    %c0_i32_1 = arith.constant 0 : i32
    return %c0_i32, %c0_i32_0 : i32, i32
  }
  func.func @transform_19(%arg0: i32) -> (i32, i32) {
    %c0_i32 = arith.constant 0 : i32
    %c0_i32_0 = arith.constant 0 : i32
    %c0_i32_1 = arith.constant 0 : i32
    return %c0_i32, %c0_i32_0 : i32, i32
  }
  func.func @transform_20(%arg0: i32) -> (i32, i32) {
    %c0_i32 = arith.constant 0 : i32
    %c0_i32_0 = arith.constant 0 : i32
    %c0_i32_1 = arith.constant 0 : i32
    return %c0_i32, %c0_i32_0 : i32, i32
  }
  func.func @transform_21(%arg0: i32) -> (i32, i32) {
    %c0_i32 = arith.constant 0 : i32
    %c0_i32_0 = arith.constant 0 : i32
    %c0_i32_1 = arith.constant 0 : i32
    return %c0_i32, %c0_i32_0 : i32, i32
  }
  func.func @transform_22(%arg0: i32) -> (i32, i32) {
    %c0_i32 = arith.constant 0 : i32
    %c0_i32_0 = arith.constant 0 : i32
    %c0_i32_1 = arith.constant 0 : i32
    return %c0_i32, %c0_i32_0 : i32, i32
  }
  func.func @transform_23(%arg0: i32) -> (i32, i32) {
    %c0_i32 = arith.constant 0 : i32
    %c0_i32_0 = arith.constant 0 : i32
    %c0_i32_1 = arith.constant 0 : i32
    return %c0_i32, %c0_i32_0 : i32, i32
  }
  func.func @transform_24(%arg0: i32) -> (i32, i32) {
    %c0_i32 = arith.constant 0 : i32
    %c0_i32_0 = arith.constant 0 : i32
    %c0_i32_1 = arith.constant 0 : i32
    return %c0_i32, %c0_i32_0 : i32, i32
  }
  func.func @transform_25(%arg0: i32) -> (i32, i32) {
    %c0_i32 = arith.constant 0 : i32
    %c0_i32_0 = arith.constant 0 : i32
    %c0_i32_1 = arith.constant 0 : i32
    return %c0_i32, %c0_i32_0 : i32, i32
  }
  func.func @transform_26(%arg0: i32) -> (i32, i32, i32) {
    %c0_i32 = arith.constant 0 : i32
    %c0_i32_0 = arith.constant 0 : i32
    %c0_i32_1 = arith.constant 0 : i32
    return %arg0, %c0_i32, %c0_i32_0 : i32, i32, i32
  }
}

</mosaic_0001>

<bundles_post_ra>
// kernel: wdcnn_forward.1
= control target key start
LH: loop header
LB: loop body
LE: loop exit
PB: predicated region body
PF: predicated region fallthrough
CT: control target
= control target key end

     0   :  { %s4216_s0 = inlined_call_operand.vmem [shape: f32[2,257,128], index: 0, kind: input, shape index: {}]   ;;  %s4217_s1 = inlined_call_operand.vmem [shape: f32[128,58], index: 1, kind: input, shape index: {}]   ;;  %s4218_s2 = inlined_call_operand.vmem [shape: f32[1,58], index: 2, kind: input, shape index: {}]   ;;  %s4219_s3 = inlined_call_operand.vmem [shape: f32[58,14], index: 3, kind: input, shape index: {}]   ;;  %s4220_s4 = inlined_call_operand.vmem [shape: f32[1,14], index: 4, kind: input, shape index: {}]   ;;  %s4221_s5 = inlined_call_operand.vmem [shape: f32[3,14], index: 5, kind: input, shape index: {}]   ;;  %s4222_s6 = inlined_call_operand.vmem [shape: f32[1,14], index: 6, kind: input, shape index: {}]   ;;  %s4223_s7 = inlined_call_operand.vmem [shape: f32[14,32], index: 7, kind: input, shape index: {}]   ;;  %s4224_s8 = inlined_call_operand.vmem [shape: f32[1,32], index: 8, kind: input, shape index: {}]   ;;  %s4225_s9 = inlined_call_operand.vmem [shape: f32[2,32], index: 9, kind: input, shape index: {}]   ;;  %s4226_s10 = inlined_call_operand.vmem [shape: f32[1,32], index: 10, kind: input, shape index: {}]   ;;  %s4227_s11 = inlined_call_operand.vmem [shape: f32[32,64], index: 11, kind: input, shape index: {}]   ;;  %s4228_s12 = inlined_call_operand.vmem [shape: f32[1,64], index: 12, kind: input, shape index: {}]   ;;  %s4229_s13 = inlined_call_operand.vmem [shape: f32[3,64], index: 13, kind: input, shape index: {}]   ;;  %s4230_s14 = inlined_call_operand.vmem [shape: f32[1,64], index: 14, kind: input, shape index: {}]   ;;  %s4231_s15 = inlined_call_operand.vmem [shape: f32[64,64], index: 15, kind: input, shape index: {}]   ;;  %s4232_s16 = inlined_call_operand.vmem [shape: f32[1,64], index: 16, kind: input, shape index: {}]   ;;  %s4233_s17 = inlined_call_operand.vmem [shape: f32[3,64], index: 17, kind: input, shape index: {}]   ;;  %s4234_s18 = inlined_call_operand.vmem [shape: f32[1,64], index: 18, kind: input, shape index: {}]   ;;  %s4235_s19 = inlined_call_operand.vmem [shape: f32[64,64], index: 19, kind: input, shape index: {}]   ;;  %s4236_s20 = inlined_call_operand.vmem [shape: f32[1,64], index: 20, kind: input, shape index: {}]   ;;  %s4237_s21 = inlined_call_operand.vmem [shape: f32[64,100], index: 21, kind: input, shape index: {}]   ;;  %s4238_s22 = inlined_call_operand.vmem [shape: f32[64,100], index: 22, kind: input, shape index: {}]   ;;  %s4239_s23 = inlined_call_operand.vmem [shape: f32[1,100], index: 23, kind: input, shape index: {}]   ;;  %s4240_s24 = inlined_call_operand.vmem [shape: f32[100,10], index: 24, kind: input, shape index: {}]   ;;  %s4241_s25 = inlined_call_operand.vmem [shape: f32[1,10], index: 25, kind: input, shape index: {}]   ;;  %s4242_s26 = inlined_call_operand.hbm [shape: f32[2,1,10], index: 26, kind: output, shape index: {}]  }
   0x1   :  { %4260 = sst [smem:[#allocation13_spill]] %s4216_s0 }
   0x2   :  { %4261 = sst [smem:[#allocation14_spill]] %s4217_s1 }
   0x3   :  { %4262 = sst [smem:[#allocation15_spill]] %s4218_s2 }
   0x4   :  { %4263 = sst [smem:[#allocation16_spill]] %s4219_s3 }
   0x5   :  { %4264 = sst [smem:[#allocation17_spill]] %s4220_s4 }
   0x6   :  { %4265 = sst [smem:[#allocation18_spill]] %s4221_s5 }
   0x7   :  { %4266 = sst [smem:[#allocation19_spill]] %s4222_s6 }
   0x8   :  { %4267 = sst [smem:[#allocation20_spill]] %s4223_s7 }
   0x9   :  { %4268 = sst [smem:[#allocation21_spill]] %s4224_s8 }
   0xa   :  { %4269 = sst [smem:[#allocation22_spill]] %s4225_s9 }
   0xb   :  { %4270 = sst [smem:[#allocation23_spill]] %s4226_s10 }
   0xc   :  { %4271 = sst [smem:[#allocation24_spill]] %s4227_s11 }
   0xd   :  { %4272 = sst [smem:[#allocation25_spill]] %s4228_s12 }
   0xe   :  { %31 = vsyncpa [#allocation4], 0 }
   0xf   :  { %33 = vsyncpa [#allocation4 + $0x1], 0  ;;  %s3139_s27 = smov 0   ;;  %s3141_s3 = smov 0  }
  0x10   :  { %s3143_s7 = smov 0   ;;  %s3145_s28 = smov 0  }
  0x11 LB: > { %4273 = sst [smem:[#allocation6_spill]] %s2988_s27  ;;  %s3160_s8 = sadd.s32 4294967295, %s3000_s28   ;;  %s3000_s28 = sphi %s3145_s28, %s4308_s28   ;;  %s2996_s7 = sphi %s3143_s7, %s4310_s7   ;;  %s2992_s3 = sphi %s3141_s3, %s4312_s3   ;;  %s2988_s27 = sphi %s3139_s27, %s4311_s27  }
  0x12   : > { %4274 = sst [smem:[#allocation7_spill]] %s2996_s7  ;;  %s2745_s4 = sadd.s32 4294967294, %s3000_s28  }
  0x13   : > { %4275 = sst [smem:[#allocation8_spill]] %s3000_s28  ;;  %s3164_s29 = sadd.s32 1, %s3000_s28  }
  0x14   : > { %4276 = sst [smem:[#allocation9_spill]] %s3164_s29  ;;  %s597_s0 = sadd.s32 1, %s2996_s7 }
  0x15   : > { %s594_s9 = ssub.s32 %s3000_s28, %s3164_s29  ;;  %p607_p0 = scmp.ne.s32.totalorder %s2996_s7, %s2992_s3 }
  0x16   : > { %p595_p1 = scmp.eq.s32.totalorder %s594_s9, 0  ;;  %p608_p2 = scmp.eq.s32.totalorder %s3160_s8, 1 }
  0x17   : > { %p613_p3 = scmp.ne.s32.totalorder %s2992_s3, %s2988_s27  ;;  %p614_p4 = scmp.eq.s32.totalorder %s2745_s4, 1 }
  0x18   : > { %s3175_s30 = scalar_select %p595_p1, %s2996_s7, %s597_s0  }
  0x19   : > { %p3177_p5 = por %p608_p2, %p607_p0  ;;  %p3181_p6 = por %p614_p4, %p613_p3 }
  0x1a   : > { %4277 = sst [smem:[#allocation10_spill]] %s3175_s30  ;;  %p2748_p7 = scmp.ge.s32.totalorder %s3000_s28, 1 }
  0x1b   : > { %s4278_s2 = scalar_select %p3177_p5, 1, 0 }
  0x1c   : > { %s4280_s5 = scalar_select %p3181_p6, 1, 0 }
  0x1d   : > { %4279 = sst [smem:[#allocation11_spill]] %s4278_s2  ;;  %p715_p8 = scmp.lt.s32.totalorder %s3000_s28, 3 }
  0x1e   : > { %4281 = sst [smem:[#allocation12_spill]] %s4280_s5 }
  0x1f   : > { %p716_p9 = pnand %p2748_p7, %p715_p8 }
  0x20   : > { %s4282_s1 = sld [smem:[#allocation14_spill]] (!%p716_p9)  ;;  %p784_p10 = scmp.lt.s32.totalorder (!%p716_p9), %s3160_s8, 1 }
  0x21   : > { %719 = sbr.rel (%p716_p9) target bundleno = 2632 (0xa48), region = 124  ;;  %s4283_s4 = sld [smem:[#allocation13_spill]] (!%p716_p9) }
  0x22   : > { %s4284_s7 = sld [smem:[#allocation16_spill]] (!%p716_p9) }
  0x23   : > { %s4286_s0 = sld [smem:[#allocation15_spill]] (!%p716_p9) }
  0x24   : > { %s4287_s2 = sld [smem:[#allocation17_spill]] (!%p716_p9) }
  0x25   : > { %s4296_s10 = sld [smem:[#allocation20_spill]] (!%p716_p9) }
  0x26   : > { %v837_v0 = vld [vmem:[%s4282_s1 + $0x78] sm:$0xff]  ;;  %v836_v1 = vld [vmem:[%s4282_s1 + $0x70] sm:$0xff]  ;;  %v835_v2 = vld [vmem:[%s4282_s1 + $0x68] sm:$0xff]  ;;  %s785_s9 = scalar_select %p784_p10, %s3160_s8, 1  ;;  %vm1070_vm0 = vcmask 1041408   ;;  %vm970_vm1 = vcmask 474112  }
  0x27   : > { %842 = vmatpush.msra.mxu0 %v837_v0  ;;  %v834_v3 = vld [vmem:[%s4282_s1 + $0x60] sm:$0xff]  ;;  %v833_v4 = vld [vmem:[%s4282_s1 + $0x58] sm:$0xff]  ;;  %v832_v5 = vld [vmem:[%s4282_s1 + $0x50] sm:$0xff]  ;;  %vm1255_vm2 = vcmask 1046528   ;;  %vm1384_vm3 = vcmask 1045504   ;;  %vm1606_vm9 = vcmask 1039360  }
  0x28   : > { %v831_v6 = vld [vmem:[%s4282_s1 + $0x48] sm:$0xff]  ;;  %v830_v7 = vld [vmem:[%s4282_s1 + $0x40] sm:$0xff]  ;;  %v829_v8 = vld [vmem:[%s4282_s1 + $0x38] sm:$0xff]  ;;  %s2867_s29 = smul.u32 264, %s785_s9  ;;  %s4298_s6 = sld [smem:[#allocation19_spill]] }
  0x29   : > { %843 = vmatpush.msra.mxu0 %v836_v1  ;;  %v828_v9 = vld [vmem:[%s4282_s1 + $0x30] sm:$0xff]  ;;  %v827_v10 = vld [vmem:[%s4282_s1 + $0x28] sm:$0xff]  ;;  %v826_v11 = vld [vmem:[%s4282_s1 + $0x20] sm:$0xff]  ;;  %s4300_s11 = sld [smem:[#allocation24_spill]] }
  0x2a   : > { %v825_v12 = vld [vmem:[%s4282_s1 + $0x18] sm:$0xff]  ;;  %v824_v13 = vld [vmem:[%s4282_s1 + $0x10] sm:$0xff]  ;;  %v823_v14 = vld [vmem:[%s4282_s1 + $0x8] sm:$0xff]  ;;  %s3237_s30 = scalar_lea.vmem %s4283_s4, %s2867_s29  ;;  %s4285_s29 = smov %s4284_s7 }
  0x2b   : > { %844 = vmatpush.msra.mxu0 %v835_v2  ;;  %v822_v15 = vld [vmem:[%s4282_s1] sm:$0xff]  ;;  %v790_v17 = vld [vmem:[%s3237_s30 + $0x8] sm:$0xff]  ;;  %v791_v18 = vld [vmem:[%s3237_s30 + $0x10] sm:$0xff]  ;;  %s4302_s4 = sld [smem:[#allocation23_spill]] }
  0x2c   : > { %v789_v16 = vld [vmem:[%s3237_s30] sm:$0xff]  ;;  %v792_v19 = vld [vmem:[%s3237_s30 + $0x18] sm:$0xff]  ;;  %v794_v21 = vld [vmem:[%s3237_s30 + $0x28] sm:$0xff]  ;;  %s4303_s12 = sld [smem:[#allocation25_spill]] }
  0x2d   : > { %845 = vmatpush.msra.mxu0 %v834_v3  ;;  %v793_v20 = vld [vmem:[%s3237_s30 + $0x20] sm:$0xff]  ;;  %v795_v22 = vld [vmem:[%s3237_s30 + $0x30] sm:$0xff]  ;;  %v796_v23 = vld [vmem:[%s3237_s30 + $0x38] sm:$0xff] }
  0x2e   : > { %v797_v24 = vld [vmem:[%s3237_s30 + $0x40] sm:$0xff]  ;;  %v798_v25 = vld [vmem:[%s3237_s30 + $0x48] sm:$0xff]  ;;  %v799_v26 = vld [vmem:[%s3237_s30 + $0x50] sm:$0xff] }
  0x2f   : > { %846 = vmatpush.msra.mxu0 %v833_v4  ;;  %v965_v27 = vld [vmem:[%s4284_s7 + $0x38] sm:$0x3]  ;;  %v964_v28 = vld [vmem:[%s4285_s29 + $0x30] sm:$0xff]  ;;  %v963_v29 = vld [vmem:[%s4285_s29 + $0x28] sm:$0xff] }
  0x30   : > { %2750 = vmatpush.msk.msra.mxu1 %vm1070_vm0, %v965_v27  ;;  %v962_v30 = vld [vmem:[%s4285_s29 + $0x20] sm:$0xff]  ;;  %v800_v31 = vld [vmem:[%s3237_s30 + $0x58] sm:$0xff]  ;;  %v960_v33 = vld [vmem:[%s4285_s29 + $0x10] sm:$0xff] }
  0x31   : > { %847 = vmatpush.msra.mxu0 %v832_v5  ;;  %v961_v32 = vld [vmem:[%s4285_s29 + $0x18] sm:$0xff]  ;;  %v959_v34 = vld [vmem:[%s4285_s29 + $0x8] sm:$0xff]  ;;  %v801_v35 = vld [vmem:[%s3237_s30 + $0x60] sm:$0xff] }
  0x32   : > { %1083 = vmatpush.msra.mxu1 %v964_v28  ;;  %v958_v36 = vld [vmem:[%s4285_s29] sm:$0xff]  ;;  %v802_v37 = vld [vmem:[%s3237_s30 + $0x68] sm:$0xff]  ;;  %v803_v38 = vld [vmem:[%s3237_s30 + $0x70] sm:$0xff] }
  0x33   : > { %848 = vmatpush.msra.mxu0 %v831_v6  ;;  %v804_v39 = vld [vmem:[%s3237_s30 + $0x78] sm:$0xff]  ;;  %v3285_v40 = vld [vmem:[%s4286_s0] ss:$0 sm:$0xff]  ;;  %v806_v45 = vld [vmem:[%s3237_s30 + $0x88] sm:$0xff]  ;;  %s4297_s0 = sld [smem:[#allocation18_spill]] }
  0x34   : > { %1084 = vmatpush.msra.mxu1 %v963_v29  ;;  %v805_v42 = vld [vmem:[%s3237_s30 + $0x80] sm:$0xff]  ;;  %v807_v48 = vld [vmem:[%s3237_s30 + $0x90] sm:$0xff]  ;;  %v808_v51 = vld [vmem:[%s3237_s30 + $0x98] sm:$0xff] }
  0x35   : > { %849 = vmatpush.msra.mxu0 %v830_v7  ;;  %v809_v54 = vld [vmem:[%s3237_s30 + $0xa0] sm:$0xff]  ;;  %v810_v57 = vld [vmem:[%s3237_s30 + $0xa8] sm:$0xff]  ;;  %v811_v60 = vld [vmem:[%s3237_s30 + $0xb0] sm:$0xff] }
  0x36   : > { %1085 = vmatpush.msra.mxu1 %v962_v30  ;;  %v812_v63 = vld [vmem:[%s3237_s30 + $0xb8] sm:$0xff]  ;;  %v813_v2 = vld [vmem:[%s3237_s30 + $0xc0] sm:$0xff]  ;;  %v814_v5 = vld [vmem:[%s3237_s30 + $0xc8] sm:$0xff] }
  0x37   : > { %850 = vmatpush.msra.mxu0 %v829_v8  ;;  %v815_v8 = vld [vmem:[%s3237_s30 + $0xd0] sm:$0xff]  ;;  %v821_v27 = vld [vmem:[%s3237_s30 + $0x100] sm:$0x1] }
  0x38   : > { %1086 = vmatpush.msra.mxu1 %v961_v32 }
  0x39   : > { %851 = vmatpush.msra.mxu0 %v828_v9 }
  0x3a   : > { %1087 = vmatpush.msra.mxu1 %v960_v33 }
  0x3b   : > { %852 = vmatpush.msra.mxu0 %v827_v10 }
  0x3c   : > { %1088 = vmatpush.msra.mxu1 %v959_v34 }
  0x3d   : > { %853 = vmatpush.msra.mxu0 %v826_v11  ;;  %v816_v11 = vld [vmem:[%s3237_s30 + $0xd8] sm:$0xff] }
  0x3e   : > { %1089 = vmatpush.msra.mxu1 %v958_v36 }
  0x3f   : > { %854 = vmatpush.msra.mxu0 %v825_v12 }
  0x41   : > { %855 = vmatpush.msra.mxu0 %v824_v13 }
  0x43   : > { %856 = vmatpush.msra.mxu0 %v823_v14  ;;  %v817_v14 = vld [vmem:[%s3237_s30 + $0xe0] sm:$0xff] }
  0x45   : > { %857 = vmatpush.msra.mxu0 %v822_v15 }
  0x46   : > { %858 = vmatmul.f32.vlgmr.msra.gmra.mxu0 %v789_v16 }
  0x4e   : > { %861 = vmatmul.f32.gmra.mxu0 %v790_v17  ;;  %v818_v17 = vld [vmem:[%s3237_s30 + $0xe8] sm:$0xff] }
  0x56   : > { %864 = vmatmul.f32.gmra.mxu0 %v791_v18 }
  0x5e   : > { %867 = vmatmul.f32.gmra.mxu0 %v792_v19 }
  0x66   : > { %870 = vmatmul.f32.gmra.mxu0 %v793_v20  ;;  %v819_v20 = vld [vmem:[%s3237_s30 + $0xf0] sm:$0xff] }
  0x6e   : > { %873 = vmatmul.f32.gmra.mxu0 %v794_v21 }
  0x76   : > { %876 = vmatmul.f32.gmra.mxu0 %v795_v22 }
  0x7e   : > { %879 = vmatmul.f32.gmra.mxu0 %v796_v23  ;;  %v820_v23 = vld [vmem:[%s3237_s30 + $0xf8] sm:$0xff]  ;;  %s4299_s30 = sld [smem:[#allocation21_spill]] }
  0x86   : > { %882 = vmatmul.f32.gmra.mxu0 %v797_v24 }
  0x8e   : > { %885 = vmatmul.f32.gmra.mxu0 %v798_v25 }
  0x96   : > { %888 = vmatmul.f32.gmra.mxu0 %v799_v26 }
  0x9e   : > { %891 = vmatmul.f32.gmra.mxu0 %v800_v31 }
  0xa6   : > { %894 = vmatmul.f32.gmra.mxu0 %v801_v35 }
  0xae   : > { %897 = vmatmul.f32.gmra.mxu0 %v802_v37 }
  0xb6   : > { %900 = vmatmul.f32.gmra.mxu0 %v803_v38 }
  0xbe   : > { %903 = vmatmul.f32.gmra.mxu0 %v804_v39 }
  0xc3   : > { %v859_v41 = vpop.f32.mrf.mxu0 }
  0xc4   : > { %v860_v43 = vadd.f32 %v3285_v40, %v859_v41 }
  0xc6   : > { %906 = vmatmul.f32.gmra.mxu0 %v805_v42  ;;  %2751 = vmatmul.msk.f32.vlgmr.msra.gmra.mxu1 %vm970_vm1, %v860_v43 }
  0xcb   : > { %v862_v44 = vpop.f32.mrf.mxu0 }
  0xcc   : > { %v863_v46 = vadd.f32 %v3285_v40, %v862_v44 }
  0xce   : > { %909 = vmatmul.f32.gmra.mxu0 %v806_v45  ;;  %2752 = vmatmul.msk.f32.gmra.mxu1 %vm970_vm1, %v863_v46 }
  0xd3   : > { %v865_v47 = vpop.f32.mrf.mxu0 }
  0xd4   : > { %v866_v49 = vadd.f32 %v3285_v40, %v865_v47 }
  0xd6   : > { %912 = vmatmul.f32.gmra.mxu0 %v807_v48  ;;  %2753 = vmatmul.msk.f32.gmra.mxu1 %vm970_vm1, %v866_v49 }
  0xdb   : > { %v868_v50 = vpop.f32.mrf.mxu0 }
  0xdc   : > { %v869_v52 = vadd.f32 %v3285_v40, %v868_v50 }
  0xde   : > { %915 = vmatmul.f32.gmra.mxu0 %v808_v51  ;;  %2754 = vmatmul.msk.f32.gmra.mxu1 %vm970_vm1, %v869_v52 }
  0xe3   : > { %v871_v53 = vpop.f32.mrf.mxu0 }
  0xe4   : > { %v872_v55 = vadd.f32 %v3285_v40, %v871_v53 }
  0xe6   : > { %918 = vmatmul.f32.gmra.mxu0 %v809_v54  ;;  %2755 = vmatmul.msk.f32.gmra.mxu1 %vm970_vm1, %v872_v55 }
  0xeb   : > { %v874_v56 = vpop.f32.mrf.mxu0 }
  0xec   : > { %v875_v58 = vadd.f32 %v3285_v40, %v874_v56 }
  0xee   : > { %921 = vmatmul.f32.gmra.mxu0 %v810_v57  ;;  %2756 = vmatmul.msk.f32.gmra.mxu1 %vm970_vm1, %v875_v58 }
  0xf3   : > { %v877_v59 = vpop.f32.mrf.mxu0 }
  0xf4   : > { %v878_v61 = vadd.f32 %v3285_v40, %v877_v59 }
  0xf6   : > { %924 = vmatmul.f32.gmra.mxu0 %v811_v60  ;;  %2757 = vmatmul.msk.f32.gmra.mxu1 %vm970_vm1, %v878_v61 }
  0xfb   : > { %v880_v62 = vpop.f32.mrf.mxu0 }
  0xfc   : > { %v881_v0 = vadd.f32 %v3285_v40, %v880_v62 }
  0xfe   : > { %927 = vmatmul.f32.gmra.mxu0 %v812_v63  ;;  %2758 = vmatmul.msk.f32.gmra.mxu1 %vm970_vm1, %v881_v0 }
 0x103   : > { %v883_v1 = vpop.f32.mrf.mxu0 }
 0x104   : > { %v884_v3 = vadd.f32 %v3285_v40, %v883_v1 }
 0x106   : > { %930 = vmatmul.f32.gmra.mxu0 %v813_v2  ;;  %2759 = vmatmul.msk.f32.gmra.mxu1 %vm970_vm1, %v884_v3 }
 0x10b   : > { %v886_v4 = vpop.f32.mrf.mxu0 }
 0x10c   : > { %v887_v6 = vadd.f32 %v3285_v40, %v886_v4 }
 0x10e   : > { %933 = vmatmul.f32.gmra.mxu0 %v814_v5  ;;  %2760 = vmatmul.msk.f32.gmra.mxu1 %vm970_vm1, %v887_v6 }
 0x113   : > { %v889_v7 = vpop.f32.mrf.mxu0 }
 0x114   : > { %v890_v9 = vadd.f32 %v3285_v40, %v889_v7 }
 0x116   : > { %936 = vmatmul.f32.gmra.mxu0 %v815_v8  ;;  %2761 = vmatmul.msk.f32.gmra.mxu1 %vm970_vm1, %v890_v9  ;;  %v3377_v8 = vld [vmem:[%s4287_s2] ss:$0 sm:$0xff]  ;;  %s4301_s2 = sld [smem:[#allocation22_spill]] }
 0x11b   : > { %v892_v10 = vpop.f32.mrf.mxu0 }
 0x11c   : > { %v893_v12 = vadd.f32 %v3285_v40, %v892_v10 }
 0x11e   : > { %939 = vmatmul.f32.gmra.mxu0 %v816_v11  ;;  %2762 = vmatmul.msk.f32.gmra.mxu1 %vm970_vm1, %v893_v12 }
 0x123   : > { %v895_v13 = vpop.f32.mrf.mxu0 }
 0x124   : > { %v896_v15 = vadd.f32 %v3285_v40, %v895_v13 }
 0x126   : > { %942 = vmatmul.f32.gmra.mxu0 %v817_v14  ;;  %2763 = vmatmul.msk.f32.gmra.mxu1 %vm970_vm1, %v896_v15 }
 0x12b   : > { %v898_v16 = vpop.f32.mrf.mxu0 }
 0x12c   : > { %v899_v18 = vadd.f32 %v3285_v40, %v898_v16 }
 0x12e   : > { %945 = vmatmul.f32.gmra.mxu0 %v818_v17  ;;  %2764 = vmatmul.msk.f32.gmra.mxu1 %vm970_vm1, %v899_v18 }
 0x133   : > { %v901_v19 = vpop.f32.mrf.mxu0 }
 0x134   : > { %v902_v21 = vadd.f32 %v3285_v40, %v901_v19 }
 0x136   : > { %948 = vmatmul.f32.gmra.mxu0 %v819_v20  ;;  %2765 = vmatmul.msk.f32.gmra.mxu1 %vm970_vm1, %v902_v21 }
 0x13b   : > { %v904_v22 = vpop.f32.mrf.mxu0 }
 0x13c   : > { %v905_v24 = vadd.f32 %v3285_v40, %v904_v22 }
 0x13e   : > { %951 = vmatmul.f32.gmra.mxu0 %v820_v23  ;;  %2766 = vmatmul.msk.f32.gmra.mxu1 %vm970_vm1, %v905_v24 }
 0x143   : > { %v907_v25 = vpop.f32.mrf.mxu0  ;;  %v3335_v26 = vpop.f32.mrf.mxu1 }
 0x144   : > { %v908_v28 = vadd.f32 %v3285_v40, %v907_v25  ;;  %v1092_v13 = vadd.f32 %v3377_v8, %v3335_v26 }
 0x146   : > { %954 = vmatmul.f32.gmra.mxu0 %v821_v27  ;;  %2767 = vmatmul.msk.f32.gmra.mxu1 %vm970_vm1, %v908_v28  ;;  %v3389_v19 = vmax.f32 %v1092_v13, 0.0 }
 0x14b   : > { %v910_v29 = vpop.f32.mrf.mxu0  ;;  %v3340_v30 = vpop.f32.mrf.mxu1 }
 0x14c   : > { %v911_v31 = vadd.f32 %v3285_v40, %v910_v29  ;;  %v1095_v15 = vadd.f32 %v3377_v8, %v3340_v30 }
 0x14e   : > { %2768 = vmatmul.msk.f32.gmra.mxu1 %vm970_vm1, %v911_v31  ;;  %v3395_v23 = vmax.f32 %v1095_v15, 0.0 }
 0x153   : > { %v913_v32 = vpop.f32.mrf.mxu0  ;;  %v1097_v33 = vpop.f32.mrf.mxu1 }
 0x154   : > { %v914_v34 = vadd.f32 %v3285_v40, %v913_v32  ;;  %v1098_v18 = vadd.f32 %v3377_v8, %v1097_v33 }
 0x156   : > { %2769 = vmatmul.msk.f32.gmra.mxu1 %vm970_vm1, %v914_v34  ;;  %v3404_v33 = vmax.f32 %v1098_v18, 0.0 }
 0x15b   : > { %v916_v35 = vpop.f32.mrf.mxu0  ;;  %v1100_v36 = vpop.f32.mrf.mxu1 }
 0x15c   : > { %v917_v37 = vadd.f32 %v3285_v40, %v916_v35  ;;  %v1101_v20 = vadd.f32 %v3377_v8, %v1100_v36 }
 0x15e   : > { %2770 = vmatmul.msk.f32.gmra.mxu1 %vm970_vm1, %v917_v37  ;;  %v3410_v37 = vmax.f32 %v1101_v20, 0.0 }
 0x163   : > { %v919_v38 = vpop.f32.mrf.mxu0  ;;  %v1103_v39 = vpop.f32.mrf.mxu1 }
 0x164   : > { %v920_v41 = vadd.f32 %v3285_v40, %v919_v38  ;;  %v1104_v24 = vadd.f32 %v3377_v8, %v1103_v39 }
 0x166   : > { %2771 = vmatmul.msk.f32.gmra.mxu1 %vm970_vm1, %v920_v41 }
 0x16b   : > { %v922_v42 = vpop.f32.mrf.mxu0  ;;  %v1106_v43 = vpop.f32.mrf.mxu1 }
 0x16c   : > { %v923_v44 = vadd.f32 %v3285_v40, %v922_v42  ;;  %v1107_v25 = vadd.f32 %v3377_v8, %v1106_v43 }
 0x16e   : > { %2772 = vmatmul.msk.f32.gmra.mxu1 %vm970_vm1, %v923_v44  ;;  %v3420_v42 = vmax.f32 %v1107_v25, 0.0 }
 0x173   : > { %v925_v45 = vpop.f32.mrf.mxu0  ;;  %v3352_v46 = vpop.f32.mrf.mxu1 }
 0x174   : > { %v926_v47 = vadd.f32 %v3285_v40, %v925_v45  ;;  %v1110_v34 = vadd.f32 %v3377_v8, %v3352_v46 }
 0x176   : > { %2773 = vmatmul.msk.f32.gmra.mxu1 %vm970_vm1, %v926_v47 }
 0x17b   : > { %v928_v48 = vpop.f32.mrf.mxu0  ;;  %v1112_v49 = vpop.f32.mrf.mxu1 }
 0x17c   : > { %v929_v50 = vadd.f32 %v3285_v40, %v928_v48  ;;  %v1113_v35 = vadd.f32 %v3377_v8, %v1112_v49  ;;  %v3429_v49 = vmax.f32 %v1110_v34, 0.0 }
 0x17e   : > { %2774 = vmatmul.msk.f32.gmra.mxu1 %vm970_vm1, %v929_v50  ;;  %v3431_v50 = vmax.f32 %v1113_v35, 0.0 }
 0x183   : > { %v931_v51 = vpop.f32.mrf.mxu0  ;;  %v3358_v52 = vpop.f32.mrf.mxu1 }
 0x184   : > { %v932_v53 = vadd.f32 %v3285_v40, %v931_v51  ;;  %v1116_v51 = vadd.f32 %v3377_v8, %v3358_v52 }
 0x186   : > { %2775 = vmatmul.msk.f32.gmra.mxu1 %vm970_vm1, %v932_v53 }
 0x18b   : > { %v934_v54 = vpop.f32.mrf.mxu0  ;;  %v1118_v55 = vpop.f32.mrf.mxu1 }
 0x18c   : > { %v935_v56 = vadd.f32 %v3285_v40, %v934_v54  ;;  %v1119_v43 = vadd.f32 %v3377_v8, %v1118_v55 }
 0x18e   : > { %2776 = vmatmul.msk.f32.gmra.mxu1 %vm970_vm1, %v935_v56 }
 0x193   : > { %v937_v57 = vpop.f32.mrf.mxu0  ;;  %v1121_v58 = vpop.f32.mrf.mxu1 }
 0x194   : > { %v938_v59 = vadd.f32 %v3285_v40, %v937_v57  ;;  %v1122_v36 = vadd.f32 %v3377_v8, %v1121_v58  ;;  %v3440_v58 = vmax.f32 %v1119_v43, 0.0  ;;  %v1267_v43 = vrot.slane %v3429_v49, 1 }
 0x196   : > { %2777 = vmatmul.msk.f32.gmra.mxu1 %vm970_vm1, %v938_v59  ;;  %v3435_v53 = vmax.f32 %v1122_v36, 0.0 }
 0x198   : > { %v1404_v35 = vrot.slane %v3435_v53, 2 }
 0x19b   : > { %v940_v60 = vpop.f32.mrf.mxu0  ;;  %v1124_v61 = vpop.f32.mrf.mxu1 }
 0x19c   : > { %v941_v62 = vadd.f32 %v3285_v40, %v940_v60  ;;  %v1125_v26 = vadd.f32 %v3377_v8, %v1124_v61 }
 0x19e   : > { %2778 = vmatmul.msk.f32.gmra.mxu1 %vm970_vm1, %v941_v62  ;;  %v3423_v44 = vmax.f32 %v1125_v26, 0.0 }
 0x1a0   : > { %v1277_v59 = vrot.slane %v3423_v44, 1  ;;  %v1406_v25 = vrot.slane %v3423_v44, 2 }
 0x1a3   : > { %v943_v63 = vpop.f32.mrf.mxu0  ;;  %v1127_v0 = vpop.f32.mrf.mxu1 }
 0x1a4   : > { %v944_v1 = vadd.f32 %v3285_v40, %v943_v63  ;;  %v1128_v21 = vadd.f32 %v3377_v8, %v1127_v0 }
 0x1a6   : > { %2779 = vmatmul.msk.f32.gmra.mxu1 %vm970_vm1, %v944_v1  ;;  %v3412_v38 = vmax.f32 %v1128_v21, 0.0 }
 0x1a8   : > { %v1279_v54 = vrot.slane %v3412_v38, 1  ;;  %v1408_v15 = vrot.slane %v3412_v38, 2 }
 0x1ab   : > { %v946_v2 = vpop.f32.mrf.mxu0  ;;  %v1130_v3 = vpop.f32.mrf.mxu1 }
 0x1ac   : > { %v947_v4 = vadd.f32 %v3285_v40, %v946_v2  ;;  %v1131_v16 = vadd.f32 %v3377_v8, %v1130_v3  ;;  %v3448_v2 = vmax.f32 %v1116_v51, 0.0  ;;  %v1275_v3 = vrot.slane %v3435_v53, 1 }
 0x1ae   : > { %2780 = vmatmul.msk.f32.gmra.mxu1 %vm970_vm1, %v947_v4  ;;  %v3400_v29 = vmax.f32 %v1131_v16, 0.0  ;;  %v1271_v20 = vrot.slane %v3448_v2, 1 }
 0x1b0   : > { %v1281_v45 = vrot.slane %v3400_v29, 1 }
 0x1b2   : > { %v1282_v1 = vsel %vm1255_vm2, %v1279_v54, %v1281_v45 }
 0x1b3   : > { %v949_v5 = vpop.f32.mrf.mxu0  ;;  %v1133_v6 = vpop.f32.mrf.mxu1  ;;  %v1363_v13 = vmax.f32 %v3412_v38, %v1282_v1  ;;  %v1409_v38 = vsel %vm1384_vm3, %v1406_v25, %v1408_v15 }
 0x1b4   : > { %v950_v7 = vadd.f32 %v3285_v40, %v949_v5  ;;  %v1134_v14 = vadd.f32 %v3377_v8, %v1133_v6  ;;  %v1410_v6 = vrot.slane %v3400_v29, 2 }
 0x1b6   : > { %2781 = vmatmul.msk.f32.gmra.mxu1 %vm970_vm1, %v950_v7  ;;  %v3393_v22 = vmax.f32 %v1134_v14, 0.0  ;;  %v1278_v14 = vsel %vm1255_vm2, %v1275_v3, %v1277_v59  ;;  %v1411_v26 = vsel %vm1384_vm3, %v1408_v15, %v1410_v6 }
 0x1b8   : > { %v1283_v39 = vrot.slane %v3393_v22, 1  ;;  %v1412_v63 = vrot.slane %v3393_v22, 2 }
 0x1ba   : > { %v1284_v57 = vsel %vm1255_vm2, %v1281_v45, %v1283_v39  ;;  %v1413_v18 = vsel %vm1384_vm3, %v1410_v6, %v1412_v63 }
 0x1bb   : > { %v952_v9 = vpop.f32.mrf.mxu0  ;;  %v1136_v10 = vpop.f32.mrf.mxu1  ;;  %v1364_v5 = vmax.f32 %v3400_v29, %v1284_v57  ;;  %v1269_v29 = vrot.slane %v3431_v50, 1  ;;  %v1400_v57 = vrot.slane %v3448_v2, 2 }
 0x1bc   : > { %v953_v11 = vadd.f32 %v3285_v40, %v952_v9  ;;  %v1137_v12 = vadd.f32 %v3377_v8, %v1136_v10  ;;  %v1280_v10 = vsel %vm1255_vm2, %v1277_v59, %v1279_v54 }
 0x1bd   : > { %v1495_v21 = vmax.f32 %v1364_v5, %v1413_v18  ;;  %v1272_v51 = vsel %vm1255_vm2, %v1269_v29, %v1271_v20  ;;  %v1394_v18 = vrot.slane %v3420_v42, 2 }
 0x1be   : > { %2782 = vmatmul.msk.f32.gmra.mxu1 %vm970_vm1, %v953_v11  ;;  %v1205_v17 = vmax.f32 %v1137_v12, 0.0  ;;  %v1273_v11 = vrot.slane %v3440_v58, 1 }
 0x1c0   : > { %v1285_v30 = vrot.slane %v1205_v17, 1  ;;  %v1414_v56 = vrot.slane %v1205_v17, 2 }
 0x1c2   : > { %v1286_v48 = vsel %vm1255_vm2, %v1283_v39, %v1285_v30  ;;  %v1415_v9 = vsel %vm1384_vm3, %v1412_v63, %v1414_v56  ;;  %v1274_v39 = vsel %vm1255_vm2, %v1271_v20, %v1273_v11  ;;  %v1358_v63 = vmax.f32 %v3431_v50, %v1272_v51 }
 0x1c3   : > { %v955_v27 = vpop.f32.mrf.mxu0  ;;  %v1139_v28 = vpop.f32.mrf.mxu1  ;;  %v1365_v62 = vmax.f32 %v3393_v22, %v1286_v48  ;;  %v1362_v22 = vmax.f32 %v3423_v44, %v1280_v10 }
 0x1c4   : > { %v956_v31 = vadd.f32 %v3285_v40, %v955_v27  ;;  %v1140_v32 = vadd.f32 %v3377_v8, %v1139_v28  ;;  %v3418_v40 = vmax.f32 %v1104_v24, 0.0  ;;  %v1276_v24 = vsel %vm1255_vm2, %v1273_v11, %v1275_v3 }
 0x1c5   : > { %v1496_v12 = vmax.f32 %v1365_v62, %v1415_v9  ;;  %v1493_v44 = vmax.f32 %v1362_v22, %v1409_v38  ;;  %v1360_v45 = vmax.f32 %v3440_v58, %v1276_v24  ;;  %v1396_v11 = vrot.slane %v3429_v49, 2 }
 0x1c6   : > { %v3415_v41 = vmax.f32 %v1140_v32, 0.0  ;;  %2783 = vmatmul.msk.f32.gmra.mxu1 %vm970_vm1, %v956_v31  ;;  %v1494_v31 = vmax.f32 %v1363_v13, %v1411_v26  ;;  %v1361_v32 = vmax.f32 %v3435_v53, %v1278_v14  ;;  %v1265_v53 = vrot.slane %v3420_v42, 1 }
 0x1c7   : > { %v1259_v14 = vrot.slane %v3404_v33, 1  ;;  %v1392_v26 = vrot.slane %v3418_v40, 2 }
 0x1c8   : > { %v1287_v46 = vrot.slane %v3415_v41, 1  ;;  %v1416_v47 = vrot.slane %v3415_v41, 2 }
 0x1ca   : > { %v1288_v55 = vsel %vm1255_vm2, %v1285_v30, %v1287_v46  ;;  %v1417_v0 = vsel %vm1384_vm3, %v1414_v56, %v1416_v47  ;;  %v1270_v56 = vsel %vm1255_vm2, %v1267_v43, %v1269_v29  ;;  %v1397_v29 = vsel %vm1384_vm3, %v1394_v18, %v1396_v11 }
 0x1cb   : > { %v1142_v60 = vpop.f32.mrf.mxu1  ;;  %v1366_v61 = vmax.f32 %v1205_v17, %v1288_v55  ;;  %v1359_v55 = vmax.f32 %v3448_v2, %v1274_v39  ;;  %v1357_v9 = vmax.f32 %v3429_v49, %v1270_v56 }
 0x1cc   : > { %v1143_v52 = vadd.f32 %v3377_v8, %v1142_v60 }
 0x1cd   : > { %v1497_v4 = vmax.f32 %v1366_v61, %v1417_v0  ;;  %v1263_v61 = vrot.slane %v3418_v40, 1  ;;  %v1398_v0 = vrot.slane %v3431_v50, 2 }
 0x1ce   : > { %v3453_v7 = vmax.f32 %v1143_v52, 0.0  ;;  %v1268_v52 = vsel %vm1255_vm2, %v1265_v53, %v1267_v43 }
 0x1cf   : > { %1643 = vmatpush.msra.mxu2 %v1497_v4  ;;  %v1261_v4 = vrot.slane %v3410_v37, 1  ;;  %v1401_v50 = vsel %vm1384_vm3, %v1398_v0, %v1400_v57  ;;  %v1266_v13 = vsel %vm1255_vm2, %v1263_v61, %v1265_v53 }
 0x1d0   : > { %v1289_v16 = vrot.slane %v3453_v7, 1  ;;  %v1418_v17 = vrot.slane %v3453_v7, 2  ;;  %v1489_v15 = vmax.f32 %v1358_v63, %v1401_v50  ;;  %v1355_v24 = vmax.f32 %v3418_v40, %v1266_v13 }
 0x1d1   : > { %1644 = vmatpush.msra.mxu2 %v1496_v12  ;;  %v1264_v49 = vsel %vm1255_vm2, %v1261_v4, %v1263_v61 }
 0x1d2   : > { %v1290_v27 = vsel %vm1255_vm2, %v1287_v46, %v1289_v16  ;;  %v1419_v28 = vsel %vm1384_vm3, %v1416_v47, %v1418_v17  ;;  %v1402_v47 = vrot.slane %v3440_v58, 2 }
 0x1d3   : > { %v1145_v30 = vpop.f32.mrf.mxu1  ;;  %1645 = vmatpush.msra.mxu2 %v1495_v21  ;;  %v1367_v34 = vmax.f32 %v3415_v41, %v1290_v27  ;;  %v1407_v41 = vsel %vm1384_vm3, %v1404_v35, %v1406_v25  ;;  %v1257_v21 = vrot.slane %v3395_v23, 1  ;;  %v1262_v25 = vsel %vm1255_vm2, %v1259_v14, %v1261_v4 }
 0x1d4   : > { %v1146_v36 = vadd.f32 %v3377_v8, %v1145_v30  ;;  %v1492_v54 = vmax.f32 %v1361_v32, %v1407_v41  ;;  %v1405_v60 = vsel %vm1384_vm3, %v1402_v47, %v1404_v35  ;;  %v1403_v1 = vsel %vm1384_vm3, %v1400_v57, %v1402_v47 }
 0x1d5   : > { %1646 = vmatpush.msra.mxu2 %v1494_v31  ;;  %v3480_v46 = vmax.f32 %v1367_v34, %v1419_v28  ;;  %v1491_v62 = vmax.f32 %v1360_v45, %v1405_v60  ;;  %v1490_v6 = vmax.f32 %v1359_v55, %v1403_v1  ;;  %v1354_v31 = vmax.f32 %v3410_v37, %v1264_v49 }
 0x1d6   : > { %v3483_v48 = vmax.f32 %v1146_v36, 0.0  ;;  %v1260_v32 = vsel %vm1255_vm2, %v1257_v21, %v1259_v14  ;;  %v1390_v34 = vrot.slane %v3410_v37, 2  ;;  %v1395_v35 = vsel %vm1384_vm3, %v1392_v26, %v1394_v18 }
 0x1d7   : > { %1647 = vmatpush.msra.mxu2 %v1493_v44  ;;  %v1486_v39 = vmax.f32 %v1355_v24, %v1395_v35  ;;  %v1353_v43 = vmax.f32 %v3404_v33, %v1262_v25  ;;  %v1388_v45 = vrot.slane %v3404_v33, 2  ;;  %v1352_v53 = vmax.f32 %v3395_v23, %v1260_v32 }
 0x1d8   : > { %v1291_v59 = vrot.slane %v3483_v48, 1  ;;  %v1420_v58 = vrot.slane %v3483_v48, 2  ;;  %v1393_v41 = vsel %vm1384_vm3, %v1390_v34, %v1392_v26  ;;  %v1386_v55 = vrot.slane %v3395_v23, 2 }
 0x1d9   : > { %1648 = vmatpush.msra.mxu2 %v1492_v54  ;;  %v1485_v51 = vmax.f32 %v1354_v31, %v1393_v41  ;;  %v1391_v57 = vsel %vm1384_vm3, %v1388_v45, %v1390_v34 }
 0x1da   : > { %v1292_v2 = vsel %vm1255_vm2, %v1289_v16, %v1291_v59  ;;  %v1421_v3 = vsel %vm1384_vm3, %v1418_v17, %v1420_v58  ;;  %v1356_v16 = vmax.f32 %v3420_v42, %v1268_v52  ;;  %v1256_v42 = vrot.slane %v3389_v19, 1 }
 0x1db   : > { %v1148_v5 = vpop.f32.mrf.mxu1  ;;  %1649 = vmatpush.msra.mxu2 %v1491_v62  ;;  %v1368_v10 = vmax.f32 %v3453_v7, %v1292_v2  ;;  %v1399_v7 = vsel %vm1384_vm3, %v1396_v11, %v1398_v0  ;;  %v1389_v61 = vsel %vm1384_vm3, %v1386_v55, %v1388_v45 }
 0x1dc   : > { %v1149_v12 = vadd.f32 %v3377_v8, %v1148_v5  ;;  %v1488_v22 = vmax.f32 %v1357_v9, %v1399_v7  ;;  %v1487_v30 = vmax.f32 %v1356_v16, %v1397_v29  ;;  %v1258_v37 = vsel %vm1255_vm2, %v1256_v42, %v1257_v21 }
 0x1dd   : > { %1650 = vmatpush.msra.mxu2 %v1490_v6  ;;  %v3510_v17 = vmax.f32 %v1368_v10, %v1421_v3  ;;  %v1351_v33 = vmax.f32 %v3389_v19, %v1258_v37  ;;  %v1483_v62 = vmax.f32 %v1352_v53, %v1389_v61 }
 0x1de   : > { %v1209_v20 = vmax.f32 %v1149_v12, 0.0 }
 0x1df   : > { %1651 = vmatpush.msra.mxu2 %v1489_v15 }
 0x1e0   : > { %v1293_v27 = vrot.slane %v1209_v20, 1  ;;  %v1422_v28 = vrot.slane %v1209_v20, 2 }
 0x1e1   : > { %1652 = vmatpush.msra.mxu2 %v1488_v22 }
 0x1e2   : > { %v1294_v36 = vsel %vm1255_vm2, %v1291_v59, %v1293_v27  ;;  %v1423_v40 = vsel %vm1384_vm3, %v1420_v58, %v1422_v28  ;;  %v1385_v59 = vrot.slane %v3389_v19, 2 }
 0x1e3   : > { %v1151_v38 = vpop.f32.mrf.mxu1  ;;  %1653 = vmatpush.msra.mxu2 %v1487_v30  ;;  %v1369_v44 = vmax.f32 %v3483_v48, %v1294_v36  ;;  %v1484_v48 = vmax.f32 %v1353_v43, %v1391_v57 }
 0x1e4   : > { %v1152_v47 = vadd.f32 %v3377_v8, %v1151_v38  ;;  %v1387_v63 = vsel %vm1384_vm3, %v1385_v59, %v1386_v55 }
 0x1e5   : > { %1654 = vmatpush.msra.mxu2 %v1486_v39  ;;  %v3534_v54 = vmax.f32 %v1369_v44, %v1423_v40  ;;  %v1482_v1 = vmax.f32 %v1351_v33, %v1387_v63 }
 0x1e6   : > { %v1210_v56 = vmax.f32 %v1152_v47, 0.0 }
 0x1e7   : > { %1655 = vmatpush.msra.mxu2 %v1485_v51 }
 0x1e8   : > { %v1295_v58 = vrot.slane %v1210_v56, 1  ;;  %v1424_v60 = vrot.slane %v1210_v56, 2 }
 0x1e9   : > { %1656 = vmatpush.msra.mxu2 %v1484_v48 }
 0x1ea   : > { %v1296_v52 = vsel %vm1255_vm2, %v1293_v27, %v1295_v58  ;;  %v1425_v23 = vsel %vm1384_vm3, %v1422_v28, %v1424_v60 }
 0x1eb   : > { %v1154_v0 = vpop.f32.mrf.mxu1  ;;  %1657 = vmatpush.msra.mxu2 %v1483_v62  ;;  %v1370_v2 = vmax.f32 %v1209_v20, %v1296_v52 }
 0x1ec   : > { %v1155_v3 = vadd.f32 %v3377_v8, %v1154_v0 }
 0x1ed   : > { %1658 = vmatpush.msra.mxu2 %v1482_v1  ;;  %v3545_v19 = vmax.f32 %v1370_v2, %v1425_v23 }
 0x1ee   : > { %v1211_v4 = vmax.f32 %v1155_v3, 0.0 }
 0x1f0   : > { %v1297_v5 = vrot.slane %v1211_v4, 1  ;;  %v1426_v6 = vrot.slane %v1211_v4, 2 }
 0x1f2   : > { %v1298_v9 = vsel %vm1255_vm2, %v1295_v58, %v1297_v5  ;;  %v1427_v10 = vsel %vm1384_vm3, %v1424_v60, %v1426_v6 }
 0x1f3   : > { %v1157_v11 = vpop.f32.mrf.mxu1  ;;  %v1371_v12 = vmax.f32 %v1210_v56, %v1298_v9 }
 0x1f4   : > { %v1158_v50 = vadd.f32 %v3377_v8, %v1157_v11 }
 0x1f5   : > { %v3550_v13 = vmax.f32 %v1371_v12, %v1427_v10  ;;  %v1514_v10 = vlaneseq }
 0x1f6   : > { %v1212_v14 = vmax.f32 %v1158_v50, 0.0 }
 0x1f8   : > { %v1299_v15 = vrot.slane %v1212_v14, 1  ;;  %v1428_v16 = vrot.slane %v1212_v14, 2 }
 0x1fa   : > { %v1300_v18 = vsel %vm1255_vm2, %v1297_v5, %v1299_v15  ;;  %v1429_v20 = vsel %vm1384_vm3, %v1426_v6, %v1428_v16 }
 0x1fb   : > { %v1160_v7 = vpop.f32.mrf.mxu1  ;;  %v1372_v49 = vmax.f32 %v1211_v4, %v1300_v18 }
 0x1fc   : > { %v1161_v21 = vadd.f32 %v3377_v8, %v1160_v7 }
 0x1fd   : > { %v3555_v22 = vmax.f32 %v1372_v49, %v1429_v20 }
 0x1fe   : > { %v1213_v24 = vmax.f32 %v1161_v21, 0.0 }
 0x200   : > { %v1301_v25 = vrot.slane %v1213_v24, 1  ;;  %v1430_v26 = vrot.slane %v1213_v24, 2 }
 0x202   : > { %v1302_v27 = vsel %vm1255_vm2, %v1299_v15, %v1301_v25  ;;  %v1431_v28 = vsel %vm1384_vm3, %v1428_v16, %v1430_v26  ;;  %v3587_v16 = vshrl.u32 %v1514_v10, 7 }
 0x203   : > { %v1163_v29 = vpop.f32.mrf.mxu1  ;;  %v1373_v42 = vmax.f32 %v1212_v14, %v1302_v27 }
 0x204   : > { %v1164_v30 = vadd.f32 %v3377_v8, %v1163_v29  ;;  %v1529_v21 = vmul.u32 3, %v3587_v16 }
 0x205   : > { %v3560_v31 = vmax.f32 %v1373_v42, %v1431_v28 }
 0x206   : > { %v1214_v32 = vmax.f32 %v1164_v30, 0.0 }
 0x208   : > { %v1303_v34 = vrot.slane %v1214_v32, 1  ;;  %v1432_v35 = vrot.slane %v1214_v32, 2 }
 0x20a   : > { %v1304_v36 = vsel %vm1255_vm2, %v1301_v25, %v1303_v34  ;;  %v1433_v40 = vsel %vm1384_vm3, %v1430_v26, %v1432_v35 }
 0x20b   : > { %v1166_v38 = vpop.f32.mrf.mxu1  ;;  %v1374_v39 = vmax.f32 %v1213_v24, %v1304_v36 }
 0x20c   : > { %v1167_v43 = vadd.f32 %v3377_v8, %v1166_v38  ;;  %v3002_v38 = vmov 1.0  }
 0x20d   : > { %v3565_v44 = vmax.f32 %v1374_v39, %v1433_v40  ;;  %v1516_v39 = vadd.s32 8, %v3587_v16 }
 0x20e   : > { %v3567_v45 = vmax.f32 %v1167_v43, 0.0 }
 0x210   : > { %v1305_v47 = vrot.slane %v3567_v45, 1  ;;  %v1434_v41 = vrot.slane %v3567_v45, 2 }
 0x212   : > { %v1306_v37 = vsel %vm1255_vm2, %v1303_v34, %v1305_v47  ;;  %v1435_v51 = vsel %vm1384_vm3, %v1432_v35, %v1434_v41 }
 0x213   : > { %v1169_v53 = vpop.f32.mrf.mxu1  ;;  %v1375_v55 = vmax.f32 %v1214_v32, %v1306_v37 }
 0x214   : > { %v1170_v0 = vadd.f32 %v3377_v8, %v1169_v53 }
 0x215   : > { %v3577_v56 = vmax.f32 %v1375_v55, %v1435_v51 }
 0x216   : > { %v1216_v11 = vmax.f32 %v1170_v0, 0.0 }
 0x218   : > { %v1307_v24 = vrot.slane %v1216_v11, 1 }
 0x21b   : > { %v1172_v57 = vpop.f32.mrf.mxu1 }
 0x21c   : > { %v1173_v1 = vadd.f32 %v3377_v8, %v1172_v57  ;;  %v1530_v57 = vmul.u32 3, %v1516_v39 }
 0x21e   : > { %v1217_v12 = vmax.f32 %v1173_v1, 0.0 }
 0x220   : > { %v1309_v27 = vrot.slane %v1217_v12, 1 }
 0x222   : > { %v1310_v55 = vsel %vm1255_vm2, %v1307_v24, %v1309_v27 }
 0x223   : > { %v1175_v48 = vpop.f32.mrf.mxu1 }
 0x224   : > { %v1176_v52 = vadd.f32 %v3377_v8, %v1175_v48 }
 0x226   : > { %v1218_v4 = vmax.f32 %v1176_v52, 0.0  ;;  %v1436_v52 = vrot.slane %v1216_v11, 2 }
 0x228   : > { %v1311_v18 = vrot.slane %v1218_v4, 1  ;;  %v1440_v51 = vrot.slane %v1218_v4, 2 }
 0x22a   : > { %v1312_v40 = vsel %vm1255_vm2, %v1309_v27, %v1311_v18 }
 0x22b   : > { %v1178_v33 = vpop.f32.mrf.mxu1 }
 0x22c   : > { %v1179_v62 = vadd.f32 %v3377_v8, %v1178_v33  ;;  %v1378_v33 = vmax.f32 %v1217_v12, %v1312_v40  ;;  %v1888_v40 = vld [vmem:[%s4296_s10] sm:$0xff] }
 0x22e   : > { %v1219_v2 = vmax.f32 %v1179_v62, 0.0  ;;  %v1377_v62 = vmax.f32 %v1216_v11, %v1310_v55  ;;  %v3749_v55 = vld [vmem:[%s4297_s0] ss:$0 sm:$0xff] }
 0x230   : > { %v1313_v50 = vrot.slane %v1219_v2, 1  ;;  %v1442_v35 = vrot.slane %v1219_v2, 2 }
 0x232   : > { %v1314_v42 = vsel %vm1255_vm2, %v1311_v18, %v1313_v50  ;;  %v1523_v18 = vadd.s32 64, %v3587_v16 }
 0x233   : > { %v1181_v59 = vpop.f32.mrf.mxu1  ;;  %v1379_v37 = vmax.f32 %v1218_v4, %v1314_v42  ;;  %v1437_v4 = vsel %vm1384_vm3, %v1434_v41, %v1436_v52  ;;  %v2187_v41 = vld [vmem:[%s4300_s11] sm:$0xff] }
 0x234   : > { %v1182_v60 = vadd.f32 %v3377_v8, %v1181_v59  ;;  %v1438_v59 = vrot.slane %v1217_v12, 2 }
 0x236   : > { %v1220_v23 = vmax.f32 %v1182_v60, 0.0  ;;  %v1308_v60 = vsel %vm1255_vm2, %v1305_v47, %v1307_v24  ;;  %v1517_v47 = vadd.s32 16, %v3587_v16 }
 0x237   : > { %v1376_v1 = vmax.f32 %v3567_v45, %v1308_v60  ;;  %v3761_v60 = vld [vmem:[%s4297_s0 + $0x2] ss:$0 sm:$0xff] }
 0x238   : > { %v1315_v6 = vrot.slane %v1220_v23, 1  ;;  %v1444_v28 = vrot.slane %v1220_v23, 2 }
 0x23a   : > { %v1316_v49 = vsel %vm1255_vm2, %v1313_v50, %v1315_v6  ;;  %v1445_v53 = vsel %vm1384_vm3, %v1442_v35, %v1444_v28  ;;  %v1522_v50 = vadd.s32 56, %v3587_v16 }
 0x23b   : > { %v1184_v58 = vpop.f32.mrf.mxu1  ;;  %v1380_v32 = vmax.f32 %v1219_v2, %v1316_v49  ;;  %v1439_v2 = vsel %vm1384_vm3, %v1436_v52, %v1438_v59  ;;  %v1524_v49 = vadd.s32 72, %v3587_v16 }
 0x23c   : > { %v1185_v61 = vadd.f32 %v3377_v8, %v1184_v58  ;;  %v1443_v58 = vsel %vm1384_vm3, %v1440_v51, %v1442_v35  ;;  %v1889_v35 = vld [vmem:[%s4296_s10 + $0x8] sm:$0x3f] }
 0x23d   : > { %v1511_v48 = vmax.f32 %v1380_v32, %v1445_v53  ;;  %2829 = vmatpush.msk.msrb.mxu2 %vm1384_vm3, %v1889_v35 }
 0x23e   : > { %v1221_v63 = vmax.f32 %v1185_v61, 0.0  ;;  %v1510_v61 = vmax.f32 %v1379_v37, %v1443_v58 }
 0x23f   : > { %1945 = vmatpush.msrb.mxu2 %v1888_v40 }
 0x240   : > { %v1317_v3 = vrot.slane %v1221_v63, 1  ;;  %v1446_v20 = vrot.slane %v1221_v63, 2 }
 0x242   : > { %v1318_v15 = vsel %vm1255_vm2, %v1315_v6, %v1317_v3  ;;  %v1382_v25 = vmax.f32 %v1221_v63, %v1317_v3  ;;  %v1447_v36 = vsel %vm1384_vm3, %v1444_v28, %v1446_v20  ;;  %v1508_v3 = vmax.f32 %v1377_v62, %v1439_v2  ;;  %v3768_v2 = vld [vmem:[%s4298_s6] ss:$0 sm:$0xff]  ;;  %v2189_v63 = vld [vmem:[%s4300_s11 + $0x10] sm:$0xff]  ;;  %s782_s6 = sand.u32 1, %s2992_s3  }
 0x243   : > { %v1187_v5 = vpop.f32.mrf.mxu1  ;;  %v1381_v26 = vmax.f32 %v1220_v23, %v1318_v15  ;;  %v1441_v23 = vsel %vm1384_vm3, %v1438_v59, %v1440_v51  ;;  %v1507_v6 = vmax.f32 %v1376_v1, %v1437_v4  ;;  %s2678_s5 = scalar_lea.sflag [#allocation4], %s782_s6 }
 0x244   : > { %v1188_v9 = vadd.f32 %v3377_v8, %v1187_v5  ;;  %v3591_v8 = vand.u32 127, %v1514_v10  ;;  %v1509_v0 = vmax.f32 %v1378_v33, %v1441_v23  ;;  %v1531_v5 = vmul.u32 3, %v1517_v47 }
 0x245   : > { %v1512_v43 = vmax.f32 %v1381_v26, %v1447_v36  ;;  %v1518_v10 = vadd.s32 24, %v3587_v16 }
 0x246   : > { %v1222_v14 = vmax.f32 %v1188_v9, 0.0  ;;  %vm3598_vm4 = vcmp.eq.s32.totalorder %v3591_v8, %v1529_v21  ;;  %vm3616_vm5 = vcmp.eq.s32.totalorder %v3591_v8, %v1530_v57  ;;  %vm3631_vm6 = vcmp.eq.s32.totalorder %v3591_v8, %v1531_v5  ;;  %v2188_v9 = vld [vmem:[%s4300_s11 + $0x8] sm:$0xff] }
 0x247   : > { %2806 = vmatmul.msk.f32.vlgmr.msra.gmra.mxu2 %vm3598_vm4, %v3002_v38  ;;  %v1532_v45 = vmul.u32 3, %v1518_v10 }
 0x248   : > { %v1448_v7 = vrot.slane %v1222_v14, 2  ;;  %v1536_v14 = vmul.u32 3, %v1522_v50 }
 0x249   : > { %vm3644_vm7 = vcmp.eq.s32.totalorder %v3591_v8, %v1532_v45 }
 0x24a   : > { %v1449_v29 = vsel %vm1384_vm3, %v1446_v20, %v1448_v7  ;;  %vm1554_vm0 = vcmp.eq.s32.totalorder %v3591_v8, %v1536_v14  ;;  %v1537_v20 = vmul.u32 3, %v1523_v18 }
 0x24b   : > { %v1513_v30 = vmax.f32 %v1382_v25, %v1449_v29  ;;  %v1525_v25 = vadd.s32 80, %v3587_v16 }
 0x24d   : > { %2817 = vmatpush.msk.msra.mxu3 %vm1255_vm2, %v1513_v30  ;;  %v1539_v26 = vmul.u32 3, %v1525_v25 }
 0x24f   : > { %1694 = vmatpush.msra.mxu3 %v1512_v43  ;;  %2807 = vmatmul.msk.f32.gmra.mxu2 %vm3616_vm5, %v3002_v38 }
 0x251   : > { %1695 = vmatpush.msra.mxu3 %v1511_v48 }
 0x253   : > { %1696 = vmatpush.msra.mxu3 %v1510_v61 }
 0x255   : > { %1697 = vmatpush.msra.mxu3 %v1509_v0 }
 0x257   : > { %1698 = vmatpush.msra.mxu3 %v1508_v3  ;;  %2808 = vmatmul.msk.f32.gmra.mxu2 %vm3631_vm6, %v3002_v38 }
 0x259   : > { %1699 = vmatpush.msra.mxu3 %v1507_v6 }
 0x25b   : > { %1700 = vmatpush.msra.mxu3 %v3577_v56  ;;  %v3649_v56 = vadd.s32 128, %v3591_v8 }
 0x25d   : > { %1701 = vmatpush.msra.mxu3 %v3565_v44  ;;  %v1519_v44 = vadd.s32 32, %v3587_v16  ;;  %vm1541_vm8 = vcmp.eq.s32.totalorder %v3649_v56, %v1529_v21  ;;  %vm1543_vm11 = vcmp.eq.s32.totalorder %v3649_v56, %v1530_v57  ;;  %vm1545_vm13 = vcmp.eq.s32.totalorder %v3649_v56, %v1531_v5  ;;  %v3754_v57 = vld [vmem:[%s4297_s0 + $0x1] ss:$0 sm:$0xff]  ;;  %s2686_s0 = scalar_lea.hbm %s4242_s26, %s3160_s8 }
 0x25e   : > { %vm1547_vm15 = vcmp.eq.s32.totalorder %v3649_v56, %v1532_v45  ;;  %v1538_v21 = vmul.u32 3, %v1524_v49  ;;  %s2690_s7 = sshll.u32 %s2686_s0, 4  ;;  %s2958_s0 = scalar_lea.hbm %s4242_s26, 2  ;;  %s2691_s7 = int_to_ptr.hbm [resolvable:$true] %s2690_s7 }
 0x25f   : > { %1702 = vmatpush.msra.mxu3 %v3560_v31  ;;  %2809 = vmatmul.msk.f32.gmra.mxu2 %vm3644_vm7, %v3002_v38  ;;  %v3003_v31 = vmov 0.0   ;;  %s2952_s27 = sshra.s32 %s2691_s7, 4  ;;  %s2953_s27 = int_to_ptr.hbm [resolvable:$true] %s2952_s27 }
 0x260   : > { %v2789_v12 = vsel %vm1545_vm13, 1.0, %v3003_v31  ;;  %v2791_v15 = vsel %vm1547_vm15, 1.0, %v3003_v31  ;;  %vm1560_vm13 = vcmp.eq.s32.totalorder %v3591_v8, %v1539_v26  ;;  %vm1557_vm15 = vcmp.eq.s32.totalorder %v3649_v56, %v1537_v20  ;;  %s2954_s8 = scalar_lea.hbm %s2953_s27, 1  ;;  %p2959_p0 = scmp.lt.s32.totalorder %s2953_s27, %s4242_s26 }
 0x261   : > { %1703 = vmatpush.msra.mxu3 %v3555_v22  ;;  %v1533_v22 = vmul.u32 3, %v1519_v44  ;;  %v2801_v29 = vsel %vm1557_vm15, 1.0, %v3003_v31  ;;  %v2788_v34 = vsel %vm3631_vm6, 1.0, %v3003_v31  ;;  %vm2274_vm6 = vcmask 220160   ;;  %p2955_p11 = scmp.ne.s32.totalorder %s2953_s27, %s2954_s8  ;;  %p2960_p1 = scmp.lt.s32.totalorder %s2958_s0, %s2954_s8 }
 0x262   : > { %vm2627_vm15 = vcmask 1043456  }
 0x263   : > { %1704 = vmatpush.msra.mxu3 %v3550_v13  ;;  %v2785_v13 = vsel %vm1541_vm8, 1.0, %v3003_v31  ;;  %vm1548_vm10 = vcmp.eq.s32.totalorder %v3591_v8, %v1533_v22  ;;  %vm1549_vm1 = vcmp.eq.s32.totalorder %v3649_v56, %v1533_v22  ;;  %vm1556_vm8 = vcmp.eq.s32.totalorder %v3591_v8, %v1537_v20  ;;  %p2956_p12 = pnand %p2955_p11, %p3177_p5  ;;  %p2961_p2 = por %p2960_p1, %p2959_p0 }
 0x264   : > { %v2793_v7 = vsel %vm1549_vm1, 1.0, %v3003_v31  ;;  %vm1561_vm1 = vcmp.eq.s32.totalorder %v3649_v56, %v1539_v26 }
 0x265   : > { %1705 = vmatpush.msra.mxu3 %v3545_v19  ;;  %v1520_v19 = vadd.s32 40, %v3587_v16  ;;  %v2805_v30 = vsel %vm1561_vm1, 1.0, %v3003_v31  ;;  %p2957_p13 = pneg %p2956_p12 }
 0x267   : > { %1706 = vmatpush.msra.mxu3 %v3534_v54  ;;  %2810 = vmatmul.msk.f32.gmra.mxu2 %vm1548_vm10, %v3002_v38  ;;  %v1534_v11 = vmul.u32 3, %v1520_v19  ;;  %v2787_v54 = vsel %vm1543_vm11, 1.0, %v3003_v31  ;;  %vm1558_vm11 = vcmp.eq.s32.totalorder %v3591_v8, %v1538_v21  ;;  %p2962_p3 = pnand %p2961_p2, %p2957_p13 }
 0x269   : > { %1707 = vmatpush.msra.mxu3 %v3510_v17  ;;  %vm1550_vm12 = vcmp.eq.s32.totalorder %v3591_v8, %v1534_v11  ;;  %v1521_v17 = vadd.s32 48, %v3587_v16  ;;  %vm1551_vm10 = vcmp.eq.s32.totalorder %v3649_v56, %v1534_v11 }
 0x26a   : > { %v2795_v24 = vsel %vm1551_vm10, 1.0, %v3003_v31  ;;  %vm1766_vm10 = vcmask 110592  }
 0x26b   : > { %1708 = vmatpush.msra.mxu3 %v3480_v46  ;;  %v1535_v46 = vmul.u32 3, %v1521_v17 }
 0x26c   : > { %2818 = vmatmul.msk.f32.vlgmr.msra.gmra.mxu3 %vm1606_vm9, %v2785_v13 }
 0x26d   : > { %vm1552_vm14 = vcmp.eq.s32.totalorder %v3591_v8, %v1535_v46 }
 0x26f   : > { %2811 = vmatmul.msk.f32.gmra.mxu2 %vm1550_vm12, %v3002_v38  ;;  %vm1553_vm12 = vcmp.eq.s32.totalorder %v3649_v56, %v1535_v46 }
 0x270   : > { %v2797_v27 = vsel %vm1553_vm12, 1.0, %v3003_v31  ;;  %vm2088_vm12 = vcmask 678912  }
 0x274   : > { %2819 = vmatmul.msk.f32.gmra.mxu3 %vm1606_vm9, %v2787_v54 }
 0x277   : > { %2812 = vmatmul.msk.f32.gmra.mxu2 %vm1552_vm14, %v3002_v38  ;;  %vm1555_vm14 = vcmp.eq.s32.totalorder %v3649_v56, %v1536_v14 }
 0x278   : > { %v2799_v28 = vsel %vm1555_vm14, 1.0, %v3003_v31  ;;  %vm2500_vm14 = vcmask 23552  }
 0x27c   : > { %2820 = vmatmul.msk.f32.gmra.mxu3 %vm1606_vm9, %v2789_v12 }
 0x27f   : > { %2813 = vmatmul.msk.f32.gmra.mxu2 %vm1554_vm0, %v3002_v38  ;;  %vm1559_vm0 = vcmp.eq.s32.totalorder %v3649_v56, %v1538_v21 }
 0x280   : > { %v2803_v42 = vsel %vm1559_vm0, 1.0, %v3003_v31 }
 0x284   : > { %2821 = vmatmul.msk.f32.gmra.mxu3 %vm1606_vm9, %v2791_v15 }
 0x287   : > { %2814 = vmatmul.msk.f32.gmra.mxu2 %vm1556_vm8, %v3002_v38  ;;  %vm1743_vm8 = vcmask 523264  }
 0x288   : > { %1744 = vst.msk [vmem:[#allocation2] sm:$0xff] %vm1743_vm8, %v3003_v31 }
 0x289   : > { %1745 = vst.msk [vmem:[#allocation2 + $0x8] sm:$0xff] %vm1743_vm8, %v3003_v31 }
 0x28a   : > { %1746 = vst.msk [vmem:[#allocation2 + $0x10] sm:$0xff] %vm1743_vm8, %v3003_v31 }
 0x28b   : > { %1747 = vst.msk [vmem:[#allocation2 + $0x18] sm:$0xff] %vm1743_vm8, %v3003_v31 }
 0x28c   : > { %2822 = vmatmul.msk.f32.gmra.mxu3 %vm1606_vm9, %v2793_v7  ;;  %1748 = vst.msk [vmem:[#allocation2 + $0x20] sm:$0xff] %vm1743_vm8, %v3003_v31 }
 0x28d   : > { %1749 = vst.msk [vmem:[#allocation2 + $0x28] sm:$0xff] %vm1743_vm8, %v3003_v31 }
 0x28e   : > { %1750 = vst.msk [vmem:[#allocation2 + $0x30] sm:$0xff] %vm1743_vm8, %v3003_v31 }
 0x28f   : > { %2815 = vmatmul.msk.f32.gmra.mxu2 %vm1558_vm11, %v3002_v38  ;;  %1751 = vst.msk [vmem:[#allocation2 + $0x38] sm:$0xff] %vm1743_vm8, %v3003_v31  ;;  %vm2101_vm11 = vcmask 1042432  }
 0x290   : > { %1752 = vst.msk [vmem:[#allocation2 + $0x40] sm:$0xff] %vm1743_vm8, %v3003_v31 }
 0x291   : > { %1753 = vst.msk [vmem:[#allocation2 + $0x48] sm:$0xff] %vm1743_vm8, %v3003_v31 }
 0x292   : > { %1754 = vst.msk [vmem:[#allocation2 + $0x50] sm:$0xff] %vm1743_vm8, %v3003_v31 }
 0x294   : > { %2823 = vmatmul.msk.f32.gmra.mxu3 %vm1606_vm9, %v2795_v24 }
 0x297   : > { %2816 = vmatmul.msk.f32.gmra.mxu2 %vm1560_vm13, %v3002_v38  ;;  %vm2403_vm13 = vcmask 64512  }
 0x29c   : > { %2824 = vmatmul.msk.f32.gmra.mxu3 %vm1606_vm9, %v2797_v27 }
 0x2a4   : > { %2825 = vmatmul.msk.f32.gmra.mxu3 %vm1606_vm9, %v2799_v28 }
 0x2ac   : > { %2826 = vmatmul.msk.f32.gmra.mxu3 %vm1606_vm9, %v2801_v29 }
 0x2b4   : > { %2827 = vmatmul.msk.f32.gmra.mxu3 %vm1606_vm9, %v2803_v42 }
 0x2bc   : > { %2828 = vmatmul.msk.f32.gmra.mxu3 %vm1606_vm9, %v2805_v30  ;;  %vm1755_vm9 = vcmask 113664  }
 0x2ca   : > { %v1660_v32 = vpop.f32.mrf.mxu2 }
 0x2d2   : > { %v1663_v36 = vpop.f32.mrf.mxu2 }
 0x2da   : > { %v1666_v38 = vpop.f32.mrf.mxu2 }
 0x2e2   : > { %v1669_v51 = vpop.f32.mrf.mxu2 }
 0x2ea   : > { %v1672_v23 = vpop.f32.mrf.mxu2 }
 0x2ef   : > { %v1710_v39 = vpop.f32.mrf.mxu3 }
 0x2f0   : > { %v1711_v43 = vadd.f32 %v1710_v39, %v1660_v32 }
 0x2f2   : > { %1756 = vst.msk [vmem:[#allocation2 + $0x1] sm:$0xff] %vm1755_vm9, %v1711_v43  ;;  %v1675_v19 = vpop.f32.mrf.mxu2 }
 0x2f7   : > { %v1713_v37 = vpop.f32.mrf.mxu3 }
 0x2f8   : > { %v1714_v53 = vadd.f32 %v1713_v37, %v1663_v36 }
 0x2f9   : > { %v1768_v48 = vld [vmem:[#allocation2] sm:$0xff] }
 0x2fa   : > { %1757 = vst.msk [vmem:[#allocation2 + $0x9] sm:$0xff] %vm1755_vm9, %v1714_v53  ;;  %v1803_v33 = vld [vmem:[#allocation2 + $0x1] sm:$0xff]  ;;  %v1781_v59 = vmul.f32 %v3749_v55, %v1768_v48  ;;  %v1678_v25 = vpop.f32.mrf.mxu2 }
 0x2fb   : > { %v1816_v58 = vmul.f32 %v3754_v57, %v1803_v33 }
 0x2fd   : > { %v1827_v0 = vadd.f32 %v1816_v58, %v1781_v59 }
 0x2ff   : > { %v1716_v61 = vpop.f32.mrf.mxu3 }
 0x300   : > { %v1717_v62 = vadd.f32 %v1716_v61, %v1666_v38 }
 0x301   : > { %v1838_v52 = vld [vmem:[#allocation2 + $0x2] sm:$0xff] }
 0x302   : > { %1758 = vst.msk [vmem:[#allocation2 + $0x11] sm:$0xff] %vm1755_vm9, %v1717_v62  ;;  %v1851_v1 = vmul.f32 %v3761_v60, %v1838_v52  ;;  %v1769_v47 = vld [vmem:[#allocation2 + $0x8] sm:$0xff]  ;;  %v1681_v53 = vpop.f32.mrf.mxu2 }
 0x303   : > { %2134 = vst.msk [vmem:[#allocation2] sm:$0xff] %vm1743_vm8, %v3003_v31  ;;  %v1804_v3 = vld [vmem:[#allocation2 + $0x9] sm:$0xff]  ;;  %v1782_v6 = vmul.f32 %v3749_v55, %v1769_v47 }
 0x304   : > { %v1862_v4 = vadd.f32 %v1851_v1, %v1827_v0  ;;  %v1817_v10 = vmul.f32 %v3754_v57, %v1804_v3 }
 0x306   : > { %v1877_v5 = vadd.f32 %v3768_v2, %v1862_v4  ;;  %v1828_v22 = vadd.f32 %v1817_v10, %v1782_v6 }
 0x307   : > { %v1719_v45 = vpop.f32.mrf.mxu3 }
 0x308   : > { %v1720_v56 = vadd.f32 %v1719_v45, %v1669_v51  ;;  %2830 = vmatmul.msk.f32.vlgmr.msrb.gmra.mxu2 %vm1755_vm9, %v1877_v5 }
 0x309   : > { %v1839_v44 = vld [vmem:[#allocation2 + $0xa] sm:$0xff] }
 0x30a   : > { %1759 = vst.msk [vmem:[#allocation2 + $0x19] sm:$0xff] %vm1755_vm9, %v1720_v56  ;;  %v1852_v13 = vmul.f32 %v3761_v60, %v1839_v44  ;;  %v1770_v11 = vld [vmem:[#allocation2 + $0x10] sm:$0xff]  ;;  %v1684_v4 = vpop.f32.mrf.mxu2 }
 0x30b   : > { %2135 = vst.msk [vmem:[#allocation2 + $0x8] sm:$0xff] %vm1743_vm8, %v3003_v31  ;;  %v1805_v54 = vld [vmem:[#allocation2 + $0x11] sm:$0xff]  ;;  %v1783_v12 = vmul.f32 %v3749_v55, %v1770_v11 }
 0x30c   : > { %v1863_v17 = vadd.f32 %v1852_v13, %v1828_v22  ;;  %v1818_v50 = vmul.f32 %v3754_v57, %v1805_v54 }
 0x30e   : > { %v1878_v46 = vadd.f32 %v3768_v2, %v1863_v17  ;;  %v1829_v20 = vadd.f32 %v1818_v50, %v1783_v12 }
 0x30f   : > { %v1722_v14 = vpop.f32.mrf.mxu3 }
 0x310   : > { %v1723_v15 = vadd.f32 %v1722_v14, %v1672_v23  ;;  %2831 = vmatmul.msk.f32.gmra.mxu2 %vm1755_vm9, %v1878_v46 }
 0x311   : > { %v1840_v18 = vld [vmem:[#allocation2 + $0x12] sm:$0xff] }
 0x312   : > { %1760 = vst.msk [vmem:[#allocation2 + $0x21] sm:$0xff] %vm1755_vm9, %v1723_v15  ;;  %v1853_v7 = vmul.f32 %v3761_v60, %v1840_v18  ;;  %v1771_v49 = vld [vmem:[#allocation2 + $0x18] sm:$0xff]  ;;  %v1687_v50 = vpop.f32.mrf.mxu2 }
 0x313   : > { %2136 = vst.msk [vmem:[#allocation2 + $0x10] sm:$0xff] %vm1743_vm8, %v3003_v31  ;;  %v1806_v21 = vld [vmem:[#allocation2 + $0x19] sm:$0xff]  ;;  %v1784_v27 = vmul.f32 %v3749_v55, %v1771_v49 }
 0x314   : > { %v1864_v24 = vadd.f32 %v1853_v7, %v1829_v20  ;;  %v1819_v28 = vmul.f32 %v3754_v57, %v1806_v21 }
 0x316   : > { %v1879_v26 = vadd.f32 %v3768_v2, %v1864_v24  ;;  %v1830_v32 = vadd.f32 %v1819_v28, %v1784_v27 }
 0x317   : > { %v1725_v29 = vpop.f32.mrf.mxu3 }
 0x318   : > { %v1726_v42 = vadd.f32 %v1725_v29, %v1675_v19  ;;  %2832 = vmatmul.msk.f32.gmra.mxu2 %vm1755_vm9, %v1879_v26 }
 0x319   : > { %v1841_v30 = vld [vmem:[#allocation2 + $0x1a] sm:$0xff] }
 0x31a   : > { %1761 = vst.msk [vmem:[#allocation2 + $0x29] sm:$0xff] %vm1755_vm9, %v1726_v42  ;;  %v1854_v35 = vmul.f32 %v3761_v60, %v1841_v30  ;;  %v1772_v36 = vld [vmem:[#allocation2 + $0x20] sm:$0xff]  ;;  %v1690_v30 = vpop.f32.mrf.mxu2 }
 0x31b   : > { %2137 = vst.msk [vmem:[#allocation2 + $0x18] sm:$0xff] %vm1743_vm8, %v3003_v31  ;;  %v1807_v40 = vld [vmem:[#allocation2 + $0x21] sm:$0xff]  ;;  %v1785_v43 = vmul.f32 %v3749_v55, %v1772_v36 }
 0x31c   : > { %v1865_v38 = vadd.f32 %v1854_v35, %v1830_v32  ;;  %v1820_v37 = vmul.f32 %v3754_v57, %v1807_v40 }
 0x31e   : > { %v1880_v39 = vadd.f32 %v3768_v2, %v1865_v38  ;;  %v1831_v59 = vadd.f32 %v1820_v37, %v1785_v43 }
 0x31f   : > { %v1728_v51 = vpop.f32.mrf.mxu3 }
 0x320   : > { %v1729_v48 = vadd.f32 %v1728_v51, %v1678_v25  ;;  %2833 = vmatmul.msk.f32.gmra.mxu2 %vm1755_vm9, %v1880_v39 }
 0x321   : > { %v1842_v33 = vld [vmem:[#allocation2 + $0x22] sm:$0xff] }
 0x322   : > { %1762 = vst.msk [vmem:[#allocation2 + $0x31] sm:$0xff] %vm1755_vm9, %v1729_v48  ;;  %v1855_v58 = vmul.f32 %v3761_v60, %v1842_v33  ;;  %v1773_v61 = vld [vmem:[#allocation2 + $0x28] sm:$0xff] }
 0x323   : > { %2138 = vst.msk [vmem:[#allocation2 + $0x20] sm:$0xff] %vm1743_vm8, %v3003_v31  ;;  %v1808_v62 = vld [vmem:[#allocation2 + $0x29] sm:$0xff]  ;;  %v1786_v0 = vmul.f32 %v3749_v55, %v1773_v61 }
 0x324   : > { %v1866_v52 = vadd.f32 %v1855_v58, %v1831_v59  ;;  %2309 = vst.msk [vmem:[#allocation2 + $0x20] sm:$0xff] %vm1743_vm8, %v3003_v31  ;;  %v1821_v1 = vmul.f32 %v3754_v57, %v1808_v62 }
 0x325   : > { %2431 = vst.msk [vmem:[#allocation2 + $0x20] sm:$0xff] %vm1743_vm8, %v3003_v31 }
 0x326   : > { %v1881_v23 = vadd.f32 %v3768_v2, %v1866_v52  ;;  %v1832_v6 = vadd.f32 %v1821_v1, %v1786_v0 }
 0x327   : > { %v1731_v47 = vpop.f32.mrf.mxu3 }
 0x328   : > { %v1732_v3 = vadd.f32 %v1731_v47, %v1681_v53  ;;  %2834 = vmatmul.msk.f32.gmra.mxu2 %vm1755_vm9, %v1881_v23 }
 0x329   : > { %v1843_v5 = vld [vmem:[#allocation2 + $0x2a] sm:$0xff] }
 0x32a   : > { %1763 = vst.msk [vmem:[#allocation2 + $0x39] sm:$0xff] %vm1755_vm9, %v1732_v3  ;;  %v1856_v10 = vmul.f32 %v3761_v60, %v1843_v5  ;;  %v1774_v45 = vld [vmem:[#allocation2 + $0x30] sm:$0xff] }
 0x32b   : > { %2139 = vst.msk [vmem:[#allocation2 + $0x28] sm:$0xff] %vm1743_vm8, %v3003_v31  ;;  %v1809_v56 = vld [vmem:[#allocation2 + $0x31] sm:$0xff]  ;;  %v1787_v13 = vmul.f32 %v3749_v55, %v1774_v45 }
 0x32c   : > { %v1867_v44 = vadd.f32 %v1856_v10, %v1832_v6  ;;  %2310 = vst.msk [vmem:[#allocation2 + $0x28] sm:$0xff] %vm1743_vm8, %v3003_v31  ;;  %v1822_v19 = vmul.f32 %v3754_v57, %v1809_v56  ;;  %v2915_v56 = vld [vmem:[%s4299_s30] ss:$0 sm:$0xff]  ;;  %s783_s30 = scalar_lea.vmem [#allocation3], %s782_s6 }
 0x32d   : > { %2432 = vst.msk [vmem:[#allocation2 + $0x28] sm:$0xff] %vm1743_vm8, %v3003_v31  ;;  %s2688_s28 = sshll.u32 %s783_s30, 4  ;;  %s2689_s28 = int_to_ptr.vmem [resolvable:$true] %s2688_s28 }
 0x32e   : > { %v1882_v22 = vadd.f32 %v3768_v2, %v1867_v44  ;;  %v1833_v46 = vadd.f32 %v1822_v19, %v1787_v13 }
 0x32f   : > { %v1734_v11 = vpop.f32.mrf.mxu3 }
 0x330   : > { %v1735_v54 = vadd.f32 %v1734_v11, %v1684_v4  ;;  %2835 = vmatmul.msk.f32.gmra.mxu2 %vm1755_vm9, %v1882_v22 }
 0x331   : > { %v1844_v17 = vld [vmem:[#allocation2 + $0x32] sm:$0xff] }
 0x332   : > { %1764 = vst.msk [vmem:[#allocation2 + $0x41] sm:$0xff] %vm1755_vm9, %v1735_v54  ;;  %v1857_v12 = vmul.f32 %v3761_v60, %v1844_v17  ;;  %v1775_v14 = vld [vmem:[#allocation2 + $0x38] sm:$0xff] }
 0x333   : > { %2140 = vst.msk [vmem:[#allocation2 + $0x30] sm:$0xff] %vm1743_vm8, %v3003_v31  ;;  %v1810_v15 = vld [vmem:[#allocation2 + $0x39] sm:$0xff]  ;;  %v1788_v7 = vmul.f32 %v3749_v55, %v1775_v14 }
 0x334   : > { %v1868_v18 = vadd.f32 %v1857_v12, %v1833_v46  ;;  %2311 = vst.msk [vmem:[#allocation2 + $0x30] sm:$0xff] %vm1743_vm8, %v3003_v31  ;;  %v1823_v49 = vmul.f32 %v3754_v57, %v1810_v15 }
 0x335   : > { %2433 = vst.msk [vmem:[#allocation2 + $0x30] sm:$0xff] %vm1743_vm8, %v3003_v31 }
 0x336   : > { %v1883_v20 = vadd.f32 %v3768_v2, %v1868_v18  ;;  %v1834_v26 = vadd.f32 %v1823_v49, %v1788_v7 }
 0x337   : > { %v1737_v21 = vpop.f32.mrf.mxu3 }
 0x338   : > { %v1738_v24 = vadd.f32 %v1737_v21, %v1687_v50  ;;  %2836 = vmatmul.msk.f32.gmra.mxu2 %vm1755_vm9, %v1883_v20 }
 0x339   : > { %v1845_v25 = vld [vmem:[#allocation2 + $0x3a] sm:$0xff] }
 0x33a   : > { %1765 = vst.msk [vmem:[#allocation2 + $0x49] sm:$0xff] %vm1755_vm9, %v1738_v24  ;;  %v1858_v27 = vmul.f32 %v3761_v60, %v1845_v25  ;;  %v1776_v28 = vld [vmem:[#allocation2 + $0x40] sm:$0xff] }
 0x33b   : > { %2141 = vst.msk [vmem:[#allocation2 + $0x38] sm:$0xff] %vm1743_vm8, %v3003_v31  ;;  %v1811_v29 = vld [vmem:[#allocation2 + $0x41] sm:$0xff]  ;;  %v1789_v35 = vmul.f32 %v3749_v55, %v1776_v28 }
 0x33c   : > { %v1869_v42 = vadd.f32 %v1858_v27, %v1834_v26  ;;  %2312 = vst.msk [vmem:[#allocation2 + $0x38] sm:$0xff] %vm1743_vm8, %v3003_v31  ;;  %v1824_v36 = vmul.f32 %v3754_v57, %v1811_v29 }
 0x33d   : > { %2434 = vst.msk [vmem:[#allocation2 + $0x38] sm:$0xff] %vm1743_vm8, %v3003_v31 }
 0x33e   : > { %v1884_v32 = vadd.f32 %v3768_v2, %v1869_v42  ;;  %v1835_v43 = vadd.f32 %v1824_v36, %v1789_v35 }
 0x33f   : > { %v1740_v40 = vpop.f32.mrf.mxu3 }
 0x340   : > { %v1741_v38 = vadd.f32 %v1740_v40, %v1690_v30  ;;  %2837 = vmatmul.msk.f32.gmra.mxu2 %vm1755_vm9, %v1884_v32 }
 0x341   : > { %v1846_v39 = vld [vmem:[#allocation2 + $0x42] sm:$0xff] }
 0x342   : > { %1767 = vst.msk [vmem:[#allocation2 + $0x51] sm:$0x1f] %vm1766_vm10, %v1741_v38  ;;  %v1859_v37 = vmul.f32 %v3761_v60, %v1846_v39  ;;  %v1777_v51 = vld [vmem:[#allocation2 + $0x48] sm:$0xff] }
 0x343   : > { %2142 = vst.msk [vmem:[#allocation2 + $0x40] sm:$0xff] %vm1743_vm8, %v3003_v31  ;;  %v1812_v53 = vld [vmem:[#allocation2 + $0x49] sm:$0xff]  ;;  %v1790_v59 = vmul.f32 %v3749_v55, %v1777_v51 }
 0x344   : > { %v1870_v48 = vadd.f32 %v1859_v37, %v1835_v43  ;;  %2313 = vst.msk [vmem:[#allocation2 + $0x40] sm:$0xff] %vm1743_vm8, %v3003_v31  ;;  %v1825_v58 = vmul.f32 %v3754_v57, %v1812_v53 }
 0x345   : > { %2435 = vst.msk [vmem:[#allocation2 + $0x40] sm:$0xff] %vm1743_vm8, %v3003_v31 }
 0x346   : > { %v1885_v33 = vadd.f32 %v3768_v2, %v1870_v48  ;;  %v1836_v23 = vadd.f32 %v1825_v58, %v1790_v59 }
 0x348   : > { %2838 = vmatmul.msk.f32.gmra.mxu2 %vm1755_vm9, %v1885_v33 }
 0x349   : > { %v1847_v61 = vld [vmem:[#allocation2 + $0x4a] sm:$0xff]  ;;  %v1848_v4 = vld [vmem:[#allocation2 + $0x52] sm:$0x1f] }
 0x34a   : > { %v1778_v62 = vld [vmem:[#allocation2 + $0x50] sm:$0x1f]  ;;  %v1860_v0 = vmul.f32 %v3761_v60, %v1847_v61  ;;  %2143 = vst.msk [vmem:[#allocation2 + $0x48] sm:$0xff] %vm1743_vm8, %v3003_v31 }
 0x34b   : > { %v1813_v52 = vld [vmem:[#allocation2 + $0x51] sm:$0x1f]  ;;  %v1791_v1 = vmul.f32 %v3749_v55, %v1778_v62  ;;  %2314 = vst.msk [vmem:[#allocation2 + $0x48] sm:$0xff] %vm1743_vm8, %v3003_v31  ;;  %v1861_v55 = vmul.f32 %v3761_v60, %v1848_v4 }
 0x34c   : > { %v1826_v47 = vmul.f32 %v3754_v57, %v1813_v52  ;;  %v1871_v3 = vadd.f32 %v1860_v0, %v1836_v23  ;;  %2436 = vst.msk [vmem:[#allocation2 + $0x48] sm:$0xff] %vm1743_vm8, %v3003_v31 }
 0x34d   : > { %2144 = vst.msk [vmem:[#allocation2 + $0x50] sm:$0xff] %vm1743_vm8, %v3003_v31 }
 0x34e   : > { %v1886_v5 = vadd.f32 %v3768_v2, %v1871_v3  ;;  %v1837_v6 = vadd.f32 %v1826_v47, %v1791_v1  ;;  %2315 = vst.msk [vmem:[#allocation2 + $0x50] sm:$0xff] %vm1743_vm8, %v3003_v31 }
 0x34f   : > { %2437 = vst.msk [vmem:[#allocation2 + $0x50] sm:$0xff] %vm1743_vm8, %v3003_v31 }
 0x350   : > { %2839 = vmatmul.msk.f32.gmra.mxu2 %vm1755_vm9, %v1886_v5  ;;  %v1872_v57 = vadd.f32 %v1861_v55, %v1837_v6 }
 0x352   : > { %v1887_v10 = vadd.f32 %v3768_v2, %v1872_v57 }
 0x358   : > { %2840 = vmatmul.msk.f32.gmra.mxu2 %vm1755_vm9, %v1887_v10  ;;  %vm2623_vm9 = vcmask 818176  }
 0x38b   : > { %v1947_v45 = vpop.f32.mrf.mxu2 }
 0x38c   : > { %v1948_v44 = vadd.f32 %v2915_v56, %v1947_v45 }
 0x38e   : > { %v1980_v13 = vmax.f32 %v1948_v44, 0.0 }
 0x390   : > { %v2002_v54 = vrot.slane %v1980_v13, 1  ;;  %v2045_v17 = vrot.slane %v1980_v13, 2 }
 0x393   : > { %v1950_v22 = vpop.f32.mrf.mxu2 }
 0x394   : > { %v1951_v19 = vadd.f32 %v2915_v56, %v1950_v22 }
 0x396   : > { %v1981_v11 = vmax.f32 %v1951_v19, 0.0 }
 0x398   : > { %v2003_v46 = vrot.slane %v1981_v11, 1  ;;  %v2046_v12 = vrot.slane %v1981_v11, 2 }
 0x39a   : > { %v2004_v60 = vsel %vm1255_vm2, %v2002_v54, %v2003_v46  ;;  %v2047_v2 = vsel %vm1384_vm3, %v2045_v17, %v2046_v12 }
 0x39b   : > { %v1953_v50 = vpop.f32.mrf.mxu2  ;;  %v2034_v14 = vmax.f32 %v1980_v13, %v2004_v60 }
 0x39c   : > { %v1954_v15 = vadd.f32 %v2915_v56, %v1953_v50 }
 0x39d   : > { %v3884_v18 = vmax.f32 %v2034_v14, %v2047_v2 }
 0x39e   : > { %v1982_v20 = vmax.f32 %v1954_v15, 0.0 }
 0x3a0   : > { %v2005_v7 = vrot.slane %v1982_v20, 1  ;;  %v2048_v49 = vrot.slane %v1982_v20, 2 }
 0x3a2   : > { %v2006_v21 = vsel %vm1255_vm2, %v2003_v46, %v2005_v7  ;;  %v2049_v24 = vsel %vm1384_vm3, %v2046_v12, %v2048_v49 }
 0x3a3   : > { %v1956_v25 = vpop.f32.mrf.mxu2  ;;  %v2035_v26 = vmax.f32 %v1981_v11, %v2006_v21 }
 0x3a4   : > { %v1957_v27 = vadd.f32 %v2915_v56, %v1956_v25 }
 0x3a5   : > { %v3888_v28 = vmax.f32 %v2035_v26, %v2049_v24 }
 0x3a6   : > { %v3890_v29 = vmax.f32 %v1957_v27, 0.0 }
 0x3a8   : > { %v2007_v42 = vrot.slane %v3890_v29, 1  ;;  %v2050_v30 = vrot.slane %v3890_v29, 2 }
 0x3aa   : > { %v2008_v32 = vsel %vm1255_vm2, %v2005_v7, %v2007_v42  ;;  %v2051_v35 = vsel %vm1384_vm3, %v2048_v49, %v2050_v30 }
 0x3ab   : > { %v1959_v36 = vpop.f32.mrf.mxu2  ;;  %v2036_v40 = vmax.f32 %v1982_v20, %v2008_v32 }
 0x3ac   : > { %v1960_v3 = vadd.f32 %v2915_v56, %v1959_v36 }
 0x3ad   : > { %v3900_v38 = vmax.f32 %v2036_v40, %v2051_v35 }
 0x3ae   : > { %v1984_v22 = vmax.f32 %v1960_v3, 0.0 }
 0x3b0   : > { %v2009_v7 = vrot.slane %v1984_v22, 1 }
 0x3b3   : > { %v1962_v39 = vpop.f32.mrf.mxu2 }
 0x3b4   : > { %v1963_v0 = vadd.f32 %v2915_v56, %v1962_v39 }
 0x3b6   : > { %v1985_v10 = vmax.f32 %v1963_v0, 0.0  ;;  %v2917_v0 = vld [vmem:[%s4301_s2 + $0x1] ss:$0 sm:$0xff] }
 0x3b8   : > { %v2011_v2 = vrot.slane %v1985_v10, 1  ;;  %v2054_v39 = vrot.slane %v1985_v10, 2 }
 0x3ba   : > { %v2012_v35 = vsel %vm1255_vm2, %v2009_v7, %v2011_v2 }
 0x3bb   : > { %v1965_v43 = vpop.f32.mrf.mxu2 }
 0x3bc   : > { %v1966_v61 = vadd.f32 %v2915_v56, %v1965_v43 }
 0x3be   : > { %v1986_v5 = vmax.f32 %v1966_v61, 0.0 }
 0x3c0   : > { %v2013_v54 = vrot.slane %v1986_v5, 1  ;;  %v2056_v27 = vrot.slane %v1986_v5, 2 }
 0x3c2   : > { %v2014_v24 = vsel %vm1255_vm2, %v2011_v2, %v2013_v54 }
 0x3c3   : > { %v1968_v37 = vpop.f32.mrf.mxu2  ;;  %v2039_v40 = vmax.f32 %v1985_v10, %v2014_v24 }
 0x3c4   : > { %v1969_v59 = vadd.f32 %v2915_v56, %v1968_v37  ;;  %v2010_v37 = vsel %vm1255_vm2, %v2007_v42, %v2009_v7 }
 0x3c6   : > { %v1987_v1 = vmax.f32 %v1969_v59, 0.0 }
 0x3c8   : > { %v2015_v45 = vrot.slane %v1987_v1, 1  ;;  %v2058_v49 = vrot.slane %v1987_v1, 2 }
 0x3ca   : > { %v2016_v15 = vsel %vm1255_vm2, %v2013_v54, %v2015_v45  ;;  %v2059_v43 = vsel %vm1384_vm3, %v2056_v27, %v2058_v49 }
 0x3cb   : > { %v1971_v51 = vpop.f32.mrf.mxu2  ;;  %v2040_v26 = vmax.f32 %v1986_v5, %v2016_v15 }
 0x3cc   : > { %v1972_v33 = vadd.f32 %v2915_v56, %v1971_v51 }
 0x3cd   : > { %v2083_v51 = vmax.f32 %v2040_v26, %v2059_v43 }
 0x3ce   : > { %v1988_v62 = vmax.f32 %v1972_v33, 0.0  ;;  %v2057_v33 = vsel %vm1384_vm3, %v2054_v39, %v2056_v27 }
 0x3cf   : > { %v2082_v59 = vmax.f32 %v2039_v40, %v2057_v33 }
 0x3d0   : > { %v2017_v6 = vrot.slane %v1988_v62, 1  ;;  %v2060_v50 = vrot.slane %v1988_v62, 2 }
 0x3d2   : > { %v2018_v46 = vsel %vm1255_vm2, %v2015_v45, %v2017_v6  ;;  %v2061_v32 = vsel %vm1384_vm3, %v2058_v49, %v2060_v50 }
 0x3d3   : > { %v1974_v53 = vpop.f32.mrf.mxu2  ;;  %v2041_v20 = vmax.f32 %v1987_v1, %v2018_v46 }
 0x3d4   : > { %v1975_v48 = vadd.f32 %v2915_v56, %v1974_v53  ;;  %v2038_v53 = vmax.f32 %v1984_v22, %v2012_v35 }
 0x3d5   : > { %v2084_v36 = vmax.f32 %v2041_v20, %v2061_v32 }
 0x3d6   : > { %v1989_v58 = vmax.f32 %v1975_v48, 0.0  ;;  %v2052_v48 = vrot.slane %v1984_v22, 2 }
 0x3d8   : > { %v2019_v47 = vrot.slane %v1989_v58, 1  ;;  %v2062_v13 = vrot.slane %v1989_v58, 2  ;;  %v2055_v61 = vsel %vm1384_vm3, %v2052_v48, %v2054_v39 }
 0x3da   : > { %v2020_v44 = vsel %vm1255_vm2, %v2017_v6, %v2019_v47  ;;  %v2063_v21 = vsel %vm1384_vm3, %v2060_v50, %v2062_v13  ;;  %v2918_v6 = vld [vmem:[%s4302_s4] ss:$0 sm:$0xff] }
 0x3db   : > { %v1977_v52 = vpop.f32.mrf.mxu2  ;;  %v2042_v60 = vmax.f32 %v1988_v62, %v2020_v44  ;;  %v2081_v62 = vmax.f32 %v2038_v53, %v2055_v61 }
 0x3dc   : > { %v1978_v23 = vadd.f32 %v2915_v56, %v1977_v52  ;;  %v2053_v52 = vsel %vm1384_vm3, %v2050_v30, %v2052_v48 }
 0x3dd   : > { %v2085_v25 = vmax.f32 %v2042_v60, %v2063_v21 }
 0x3de   : > { %v1990_v4 = vmax.f32 %v1978_v23, 0.0  ;;  %v3926_v23 = vsel %vm3598_vm4, 1.0, %v3003_v31  ;;  %vm2145_vm4 = vcmask 261120  }
 0x3e0   : > { %v2021_v55 = vrot.slane %v1990_v4, 1  ;;  %v2064_v57 = vrot.slane %v1990_v4, 2 }
 0x3e2   : > { %v2044_v19 = vmax.f32 %v1990_v4, %v2021_v55  ;;  %v2022_v11 = vsel %vm1255_vm2, %v2019_v47, %v2021_v55  ;;  %v2065_v12 = vsel %vm1384_vm3, %v2062_v13, %v2064_v57 }
 0x3e3   : > { %v2043_v17 = vmax.f32 %v1989_v58, %v2022_v11  ;;  %v2037_v58 = vmax.f32 %v3890_v29, %v2010_v37  ;;  %v3934_v29 = vsel %vm3616_vm5, 1.0, %v3003_v31  ;;  %vm2149_vm5 = vcmask 257024  }
 0x3e4   : > { %v2087_v56 = vmax.f32 %v2044_v19, %v2064_v57 }
 0x3e5   : > { %v2086_v14 = vmax.f32 %v2043_v17, %v2065_v12  ;;  %v2080_v42 = vmax.f32 %v2037_v58, %v2053_v52 }
 0x3e6   : > { %2841 = vmatpush.msk.msrb.mxu3 %vm2101_vm11, %v2087_v56 }
 0x3e8   : > { %2111 = vmatpush.msrb.mxu3 %v2086_v14 }
 0x3ea   : > { %2112 = vmatpush.msrb.mxu3 %v2085_v25  ;;  %v2919_v25 = vld [vmem:[%s4303_s12] ss:$0 sm:$0xff] }
 0x3ec   : > { %2113 = vmatpush.msrb.mxu3 %v2084_v36 }
 0x3ee   : > { %2114 = vmatpush.msrb.mxu3 %v2083_v51 }
 0x3f0   : > { %2115 = vmatpush.msrb.mxu3 %v2082_v59 }
 0x3f2   : > { %2116 = vmatpush.msrb.mxu3 %v2081_v62 }
 0x3f4   : > { %2117 = vmatpush.msrb.mxu3 %v2080_v42 }
 0x3f6   : > { %2118 = vmatpush.msrb.mxu3 %v3900_v38  ;;  %v2916_v38 = vld [vmem:[%s4301_s2] ss:$0 sm:$0xff] }
 0x3f8   : > { %2119 = vmatpush.msrb.mxu3 %v3888_v28  ;;  %v2790_v28 = vsel %vm3644_vm7, 1.0, %v3003_v31 }
 0x3fa   : > { %2120 = vmatpush.msrb.mxu3 %v3884_v18  ;;  %v2190_v18 = vld [vmem:[%s4300_s11 + $0x18] sm:$0xff] }
 0x3fb   : > { %2842 = vmatmul.msk.f32.vlgmr.msrb.gmra.mxu3 %vm2088_vm12, %v3926_v23 }
 0x3fc   : > { %2219 = vmatpush.msra.mxu3 %v2190_v18 }
 0x3fe   : > { %2220 = vmatpush.msra.mxu3 %v2189_v63 }
 0x400   : > { %2221 = vmatpush.msra.mxu3 %v2188_v9 }
 0x402   : > { %2222 = vmatpush.msra.mxu3 %v2187_v41 }
 0x403   : > { %2843 = vmatmul.msk.f32.gmra.mxu3 %vm2088_vm12, %v3934_v29 }
 0x40b   : > { %2844 = vmatmul.msk.f32.gmra.mxu3 %vm2088_vm12, %v2788_v34 }
 0x413   : > { %2845 = vmatmul.msk.f32.gmra.mxu3 %vm2088_vm12, %v2790_v28 }
 0x47e   : > { %v2122_v30 = vpop.f32.mrf.mxu3 }
 0x47f   : > { %2146 = vst.msk [vmem:[#allocation2 + $0x1] sm:$0xff] %vm2145_vm4, %v2122_v30 }
 0x486   : > { %v2125_v1 = vpop.f32.mrf.mxu3  ;;  %v2151_v47 = vld [vmem:[#allocation2] sm:$0xff] }
 0x487   : > { %v2165_v3 = vld [vmem:[#allocation2 + $0x1] sm:$0xff]  ;;  %2147 = vst.msk [vmem:[#allocation2 + $0x9] sm:$0xff] %vm2145_vm4, %v2125_v1  ;;  %v2157_v4 = vmul.f32 %v2916_v38, %v2151_v47 }
 0x488   : > { %v2171_v5 = vmul.f32 %v2917_v0, %v2165_v3  ;;  %2305 = vst.msk [vmem:[#allocation2] sm:$0xff] %vm1743_vm8, %v3003_v31 }
 0x48a   : > { %v2175_v55 = vadd.f32 %v2171_v5, %v2157_v4  ;;  %v2356_v5 = vld [vmem:[%s4231_s15 + $0x38] sm:$0xff] }
 0x48c   : > { %v2183_v57 = vadd.f32 %v2918_v6, %v2175_v55  ;;  %v2354_v55 = vld [vmem:[%s4231_s15 + $0x28] sm:$0xff] }
 0x48e   : > { %2846 = vmatmul.msk.f32.vlgmr.msra.gmra.mxu3 %vm2145_vm4, %v2183_v57  ;;  %v2128_v10 = vpop.f32.mrf.mxu3  ;;  %v2152_v45 = vld [vmem:[#allocation2 + $0x8] sm:$0xff]  ;;  %v2351_v57 = vld [vmem:[%s4231_s15 + $0x10] sm:$0xff] }
 0x48f   : > { %v2166_v44 = vld [vmem:[#allocation2 + $0x9] sm:$0xff]  ;;  %2148 = vst.msk [vmem:[#allocation2 + $0x11] sm:$0xff] %vm2145_vm4, %v2128_v10  ;;  %v2158_v22 = vmul.f32 %v2916_v38, %v2152_v45  ;;  %v2349_v45 = vld [vmem:[%s4231_s15] sm:$0xff] }
 0x490   : > { %v2172_v13 = vmul.f32 %v2917_v0, %v2166_v44  ;;  %2306 = vst.msk [vmem:[#allocation2 + $0x8] sm:$0xff] %vm1743_vm8, %v3003_v31  ;;  %v2350_v10 = vld [vmem:[%s4231_s15 + $0x8] sm:$0xff] }
 0x492   : > { %v2176_v19 = vadd.f32 %v2172_v13, %v2158_v22  ;;  %v2920_v13 = vld [vmem:[%s4229_s13] ss:$0 sm:$0xff] }
 0x494   : > { %v2184_v11 = vadd.f32 %v2918_v6, %v2176_v19  ;;  %v2921_v19 = vld [vmem:[%s4229_s13 + $0x1] ss:$0 sm:$0xff] }
 0x496   : > { %2847 = vmatmul.msk.f32.gmra.mxu3 %vm2145_vm4, %v2184_v11  ;;  %v2131_v54 = vpop.f32.mrf.mxu3  ;;  %v2153_v17 = vld [vmem:[#allocation2 + $0x10] sm:$0xff] }
 0x497   : > { %v2167_v46 = vld [vmem:[#allocation2 + $0x11] sm:$0xff]  ;;  %2150 = vst.msk [vmem:[#allocation2 + $0x19] sm:$0xf] %vm2149_vm5, %v2131_v54  ;;  %v2159_v56 = vmul.f32 %v2916_v38, %v2153_v17 }
 0x498   : > { %v2173_v12 = vmul.f32 %v2917_v0, %v2167_v46  ;;  %2307 = vst.msk [vmem:[#allocation2 + $0x10] sm:$0xff] %vm1743_vm8, %v3003_v31 }
 0x499   : > { %2429 = vst.msk [vmem:[#allocation2 + $0x10] sm:$0xff] %vm1743_vm8, %v3003_v31 }
 0x49a   : > { %v2177_v60 = vadd.f32 %v2173_v12, %v2159_v56  ;;  %v2922_v56 = vld [vmem:[%s4229_s13 + $0x2] ss:$0 sm:$0xff] }
 0x49c   : > { %v2185_v2 = vadd.f32 %v2918_v6, %v2177_v60 }
 0x49e   : > { %2848 = vmatmul.msk.f32.gmra.mxu3 %vm2145_vm4, %v2185_v2  ;;  %v2154_v50 = vld [vmem:[#allocation2 + $0x18] sm:$0x1f] }
 0x49f   : > { %v2168_v14 = vld [vmem:[#allocation2 + $0x19] sm:$0x1f]  ;;  %v2160_v15 = vmul.f32 %v2916_v38, %v2154_v50 }
 0x4a0   : > { %v2174_v20 = vmul.f32 %v2917_v0, %v2168_v14  ;;  %2308 = vst.msk [vmem:[#allocation2 + $0x18] sm:$0xff] %vm1743_vm8, %v3003_v31 }
 0x4a1   : > { %2430 = vst.msk [vmem:[#allocation2 + $0x18] sm:$0xff] %vm1743_vm8, %v3003_v31 }
 0x4a2   : > { %v2178_v7 = vadd.f32 %v2174_v20, %v2160_v15  ;;  %v2923_v15 = vld [vmem:[%s4230_s14] ss:$0 sm:$0xff] }
 0x4a4   : > { %v2186_v49 = vadd.f32 %v2918_v6, %v2178_v7  ;;  %v2355_v6 = vld [vmem:[%s4231_s15 + $0x30] sm:$0xff]  ;;  %v2336_v7 = vld [vmem:[#allocation2 + $0xa] sm:$0x1] }
 0x4a6   : > { %2849 = vmatmul.msk.f32.gmra.mxu3 %vm2145_vm4, %v2186_v49 }
 0x511   : > { %v2224_v21 = vpop.f32.mrf.mxu3 }
 0x512   : > { %v2225_v35 = vadd.f32 %v2919_v25, %v2224_v21 }
 0x514   : > { %v2236_v37 = vmax.f32 %v2225_v35, 0.0 }
 0x516   : > { %v2244_v58 = vrot.slane %v2236_v37, 1  ;;  %v2259_v0 = vrot.slane %v2236_v37, 2 }
 0x519   : > { %v2227_v24 = vpop.f32.mrf.mxu3 }
 0x51a   : > { %v2228_v32 = vadd.f32 %v2919_v25, %v2227_v24 }
 0x51c   : > { %v2237_v40 = vmax.f32 %v2228_v32, 0.0 }
 0x51e   : > { %v2245_v48 = vrot.slane %v2237_v40, 1  ;;  %v2260_v41 = vrot.slane %v2237_v40, 2 }
 0x520   : > { %v2246_v28 = vsel %vm1255_vm2, %v2244_v58, %v2245_v48  ;;  %v2261_v3 = vsel %vm1384_vm3, %v2259_v0, %v2260_v41 }
 0x521   : > { %v2230_v26 = vpop.f32.mrf.mxu3  ;;  %v2255_v38 = vmax.f32 %v2236_v37, %v2246_v28  ;;  %v2460_v28 = vld [vmem:[%s4235_s19] sm:$0xff] }
 0x522   : > { %v2231_v27 = vadd.f32 %v2919_v25, %v2230_v26  ;;  %v2340_v26 = vmul.f32 %v2922_v56, %v2336_v7  ;;  %v2534_v7 = vld [vmem:[%s4238_s22] sm:$0xff] }
 0x523   : > { %v2270_v4 = vmax.f32 %v2255_v38, %v2261_v3 }
 0x524   : > { %v2238_v36 = vmax.f32 %v2231_v27, 0.0 }
 0x526   : > { %v2247_v51 = vrot.slane %v2238_v36, 1  ;;  %v2262_v62 = vrot.slane %v2238_v36, 2 }
 0x528   : > { %v2248_v61 = vsel %vm1255_vm2, %v2245_v48, %v2247_v51  ;;  %v2263_v1 = vsel %vm1384_vm3, %v2260_v41, %v2262_v62  ;;  %v2927_v41 = vld [vmem:[%s4233_s17 + $0x2] ss:$0 sm:$0xff] }
 0x529   : > { %v2233_v39 = vpop.f32.mrf.mxu3  ;;  %v2256_v9 = vmax.f32 %v2237_v40, %v2248_v61 }
 0x52a   : > { %v2234_v43 = vadd.f32 %v2919_v25, %v2233_v39 }
 0x52b   : > { %v2271_v47 = vmax.f32 %v2256_v9, %v2263_v1  ;;  %v2926_v9 = vld [vmem:[%s4233_s17 + $0x1] ss:$0 sm:$0xff] }
 0x52c   : > { %v2239_v53 = vmax.f32 %v2234_v43, 0.0 }
 0x52e   : > { %v2249_v33 = vrot.slane %v2239_v53, 1  ;;  %v2264_v59 = vrot.slane %v2239_v53, 2 }
 0x530   : > { %v2258_v52 = vmax.f32 %v2239_v53, %v2249_v33  ;;  %v2250_v42 = vsel %vm1255_vm2, %v2247_v51, %v2249_v33  ;;  %v2265_v63 = vsel %vm1384_vm3, %v2262_v62, %v2264_v59  ;;  %vm2317_vm3 = vcmask 516096   ;;  %v2467_v62 = vld [vmem:[%s4235_s19 + $0x38] sm:$0xff] }
 0x531   : > { %v2257_v34 = vmax.f32 %v2238_v36, %v2250_v42  ;;  %v2924_v36 = vld [vmem:[%s4232_s16] ss:$0 sm:$0xff]  ;;  %v2399_v51 = vmul.u32 2, %v3587_v16  ;;  %v2466_v16 = vld [vmem:[%s4235_s19 + $0x30] sm:$0xff] }
 0x532   : > { %v2273_v18 = vmax.f32 %v2258_v52, %v2264_v59  ;;  %v2463_v52 = vld [vmem:[%s4235_s19 + $0x18] sm:$0xff]  ;;  %v2462_v42 = vld [vmem:[%s4235_s19 + $0x10] sm:$0xff] }
 0x533   : > { %v2272_v30 = vmax.f32 %v2257_v34, %v2265_v63  ;;  %vm2400_vm7 = vcmp.eq.s32.totalorder %v3591_v8, %v2399_v51  ;;  %v2465_v8 = vld [vmem:[%s4235_s19 + $0x28] sm:$0xff]  ;;  %v2925_v63 = vld [vmem:[%s4233_s17] ss:$0 sm:$0xff] }
 0x534   : > { %2850 = vmatpush.msk.msrb.mxu3 %vm2101_vm11, %v2273_v18  ;;  %v2855_v61 = vsel %vm2400_vm7, 1.0, %v3003_v31  ;;  %v2461_v34 = vld [vmem:[%s4235_s19 + $0x8] sm:$0xff] }
 0x535   : > { %v2610_v51 = vld [vmem:[%s4240_s24 + $0x8] sm:$0xff] }
 0x536   : > { %2295 = vmatpush.msrb.mxu3 %v2272_v30 }
 0x538   : > { %2296 = vmatpush.msrb.mxu3 %v2271_v47 }
 0x53a   : > { %2297 = vmatpush.msrb.mxu3 %v2270_v4 }
 0x53b   : > { %2851 = vmatmul.msk.f32.vlgmr.msrb.gmra.mxu3 %vm2274_vm6, %v3926_v23  ;;  %v2353_v23 = vld [vmem:[%s4231_s15 + $0x20] sm:$0xff] }
 0x53c   : > { %2375 = vmatpush.msra.mxu3 %v2356_v5  ;;  %v2928_v5 = vld [vmem:[%s4234_s18] ss:$0 sm:$0xff] }
 0x53e   : > { %2376 = vmatpush.msra.mxu3 %v2355_v6 }
 0x540   : > { %2377 = vmatpush.msra.mxu3 %v2354_v55 }
 0x542   : > { %2378 = vmatpush.msra.mxu3 %v2353_v23  ;;  %v2533_v23 = vld [vmem:[%s4237_s21 + $0x38] sm:$0xff] }
 0x543   : > { %2852 = vmatmul.msk.f32.gmra.mxu3 %vm2274_vm6, %v3934_v29  ;;  %v2352_v29 = vld [vmem:[%s4231_s15 + $0x18] sm:$0xff] }
 0x544   : > { %2379 = vmatpush.msra.mxu3 %v2352_v29  ;;  %v2532_v29 = vld [vmem:[%s4237_s21 + $0x30] sm:$0xff] }
 0x546   : > { %2380 = vmatpush.msra.mxu3 %v2351_v57  ;;  %v2531_v57 = vld [vmem:[%s4237_s21 + $0x28] sm:$0xff] }
 0x548   : > { %2381 = vmatpush.msra.mxu3 %v2350_v10  ;;  %v2530_v10 = vld [vmem:[%s4237_s21 + $0x20] sm:$0xff] }
 0x54a   : > { %2382 = vmatpush.msra.mxu3 %v2349_v45  ;;  %v2529_v45 = vld [vmem:[%s4237_s21 + $0x18] sm:$0xff] }
 0x54c   : > { %2483 = vmatpush.msrb.mxu3 %v2467_v62 }
 0x54e   : > { %2484 = vmatpush.msrb.mxu3 %v2466_v16 }
 0x550   : > { %2485 = vmatpush.msrb.mxu3 %v2465_v8 }
 0x5be   : > { %v2299_v44 = vpop.f32.mrf.mxu3 }
 0x5bf   : > { %2316 = vst.msk [vmem:[#allocation2 + $0x1] sm:$0xff] %vm1743_vm8, %v2299_v44  ;;  %v2528_v44 = vld [vmem:[%s4237_s21 + $0x10] sm:$0xff] }
 0x5c6   : > { %v2302_v22 = vpop.f32.mrf.mxu3  ;;  %v2319_v11 = vld [vmem:[#allocation2] sm:$0xff]  ;;  %v2320_v60 = vld [vmem:[#allocation2 + $0x8] sm:$0x1] }
 0x5c7   : > { %2318 = vst.msk [vmem:[#allocation2 + $0x9] sm:$0x1] %vm2317_vm3, %v2302_v22  ;;  %v2327_v54 = vld [vmem:[#allocation2 + $0x1] sm:$0xff]  ;;  %v2323_v17 = vmul.f32 %v2920_v13, %v2319_v11  ;;  %v2324_v21 = vmul.f32 %v2920_v13, %v2320_v60  ;;  %v2929_v22 = vld [vmem:[%s4236_s20] ss:$0 sm:$0xff] }
 0x5c8   : > { %v2331_v46 = vmul.f32 %v2921_v19, %v2327_v54  ;;  %v2538_v60 = vld [vmem:[%s4238_s22 + $0x20] sm:$0xff] }
 0x5ca   : > { %v2333_v50 = vadd.f32 %v2331_v46, %v2323_v17  ;;  %v2541_v46 = vld [vmem:[%s4238_s22 + $0x38] sm:$0xff] }
 0x5ce   : > { %v2335_v12 = vld [vmem:[#allocation2 + $0x2] sm:$0xff] }
 0x5cf   : > { %v2328_v2 = vld [vmem:[#allocation2 + $0x9] sm:$0x1]  ;;  %v2339_v14 = vmul.f32 %v2922_v56, %v2335_v12  ;;  %2427 = vst.msk [vmem:[#allocation2] sm:$0xff] %vm1743_vm8, %v3003_v31  ;;  %v2540_v56 = vld [vmem:[%s4238_s22 + $0x30] sm:$0xff] }
 0x5d0   : > { %v2332_v20 = vmul.f32 %v2921_v19, %v2328_v2  ;;  %2428 = vst.msk [vmem:[#allocation2 + $0x8] sm:$0xff] %vm1743_vm8, %v3003_v31  ;;  %v2464_v31 = vld [vmem:[%s4235_s19 + $0x20] sm:$0xff]  ;;  %v2539_v12 = vld [vmem:[%s4238_s22 + $0x28] sm:$0xff]  ;;  %v2537_v2 = vld [vmem:[%s4238_s22 + $0x18] sm:$0xff] }
 0x5d1   : > { %v2341_v49 = vadd.f32 %v2339_v14, %v2333_v50  ;;  %2486 = vmatpush.msrb.mxu3 %v2464_v31  ;;  %v2536_v50 = vld [vmem:[%s4238_s22 + $0x10] sm:$0xff]  ;;  %v2527_v14 = vld [vmem:[%s4237_s21 + $0x8] sm:$0xff] }
 0x5d2   : > { %v2334_v25 = vadd.f32 %v2332_v20, %v2324_v21  ;;  %v2526_v20 = vld [vmem:[%s4237_s21] sm:$0xff] }
 0x5d3   : > { %v2347_v24 = vadd.f32 %v2923_v15, %v2341_v49  ;;  %2487 = vmatpush.msrb.mxu3 %v2463_v52 }
 0x5d4   : > { %v2342_v27 = vadd.f32 %v2340_v26, %v2334_v25  ;;  %v2620_v25 = vld [vmem:[%s4240_s24 + $0x58] sm:$0xff]  ;;  %v2619_v26 = vld [vmem:[%s4240_s24 + $0x50] sm:$0xff] }
 0x5d5   : > { %2853 = vmatmul.msk.f32.vlgmr.msra.gmra.mxu3 %vm1743_vm8, %v2347_v24  ;;  %v2621_v24 = vld [vmem:[%s4240_s24 + $0x60] sm:$0xf] }
 0x5d6   : > { %v2348_v32 = vadd.f32 %v2923_v15, %v2342_v27  ;;  %2488 = vmatpush.msrb.mxu3 %v2462_v42  ;;  %v2535_v15 = vld [vmem:[%s4238_s22 + $0x8] sm:$0xff] }
 0x5d7   : > { %v2618_v27 = vld [vmem:[%s4240_s24 + $0x48] sm:$0xff] }
 0x5d8   : > { %2489 = vmatpush.msrb.mxu3 %v2461_v34 }
 0x5da   : > { %2490 = vmatpush.msrb.mxu3 %v2460_v28 }
 0x5dc   : > { %2576 = vmatpush.msra.mxu3 %v2533_v23 }
 0x5dd   : > { %2854 = vmatmul.msk.f32.gmra.mxu3 %vm1743_vm8, %v2348_v32  ;;  %v2617_v32 = vld [vmem:[%s4240_s24 + $0x40] sm:$0xff] }
 0x5de   : > { %2577 = vmatpush.msra.mxu3 %v2532_v29 }
 0x5e0   : > { %2578 = vmatpush.msra.mxu3 %v2531_v57 }
 0x5e2   : > { %2579 = vmatpush.msra.mxu3 %v2530_v10 }
 0x5e4   : > { %2580 = vmatpush.msra.mxu3 %v2529_v45 }
 0x5e6   : > { %2581 = vmatpush.msra.mxu3 %v2528_v44 }
 0x5e8   : > { %2582 = vmatpush.msra.mxu3 %v2527_v14 }
 0x5ea   : > { %2583 = vmatpush.msra.mxu3 %v2526_v20 }
 0x658   : > { %v2384_v35 = vpop.f32.mrf.mxu3 }
 0x659   : > { %v2385_v40 = vadd.f32 %v2924_v36, %v2384_v35  ;;  %v2616_v35 = vld [vmem:[%s4240_s24 + $0x38] sm:$0xff] }
 0x65b   : > { %v2390_v43 = vmax.f32 %v2385_v40, 0.0  ;;  %v2614_v40 = vld [vmem:[%s4240_s24 + $0x28] sm:$0xff] }
 0x65d   : > { %v2394_v48 = vrot.slane %v2390_v43, 1 }
 0x660   : > { %v2387_v39 = vpop.f32.mrf.mxu3 }
 0x661   : > { %v2388_v37 = vadd.f32 %v2924_v36, %v2387_v39  ;;  %v2615_v36 = vld [vmem:[%s4240_s24 + $0x30] sm:$0xff]  ;;  %v2613_v39 = vld [vmem:[%s4240_s24 + $0x20] sm:$0xff] }
 0x663   : > { %v2391_v53 = vmax.f32 %v2388_v37, 0.0  ;;  %v2611_v37 = vld [vmem:[%s4240_s24 + $0x10] sm:$0xff] }
 0x665   : > { %v2395_v33 = vrot.slane %v2391_v53, 1  ;;  %v2609_v53 = vld [vmem:[%s4240_s24] sm:$0xff] }
 0x667   : > { %v2396_v59 = vsel %vm1255_vm2, %v2394_v48, %v2395_v33  ;;  %vm2438_vm2 = vcmask 519168  }
 0x668   : > { %v2398_v58 = vmax.f32 %v2390_v43, %v2396_v59  ;;  %v2612_v43 = vld [vmem:[%s4240_s24 + $0x18] sm:$0xff]  ;;  %v2588_v59 = vld [vmem:[%s4239_s23] sm:$0x1] }
 0x66a   : > { %2422 = vmatpush.msra.mxu2 %v2398_v58 }
 0x66b   : > { %2856 = vmatmul.msk.f32.vlgmr.msra.gmra.mxu2 %vm2403_vm13, %v2855_v61 }
 0x6ee   : > { %v2424_v18 = vpop.f32.mrf.mxu2 }
 0x6ef   : > { %2439 = vst.msk [vmem:[#allocation2 + $0x1] sm:$0xf] %vm2438_vm2, %v2424_v18 }
 0x6f6   : > { %v2440_v30 = vld [vmem:[#allocation2] sm:$0xf] }
 0x6f7   : > { %v2445_v38 = vld [vmem:[#allocation2 + $0x1] sm:$0xf]  ;;  %v2443_v1 = vmul.f32 %v2925_v63, %v2440_v30 }
 0x6f8   : > { %v2450_v0 = vld [vmem:[#allocation2 + $0x2] sm:$0xf]  ;;  %v2448_v47 = vmul.f32 %v2926_v9, %v2445_v38  ;;  %v2622_v38 = vld [vmem:[%s4241_s25] sm:$0x1] }
 0x6f9   : > { %v2453_v4 = vmul.f32 %v2927_v41, %v2450_v0 }
 0x6fa   : > { %v2449_v3 = vadd.f32 %v2448_v47, %v2443_v1 }
 0x6fc   : > { %v2454_v6 = vadd.f32 %v2453_v4, %v2449_v3 }
 0x6fe   : > { %v2459_v55 = vadd.f32 %v2928_v5, %v2454_v6 }
 0x700   : > { %2857 = vmatmul.msk.f32.vlgmr.msrb.gmra.mxu3 %vm1743_vm8, %v2459_v55 }
 0x783   : > { %v2492_v13 = vpop.f32.mrf.mxu3 }
 0x784   : > { %v2493_v19 = vadd.f32 %v2929_v22, %v2492_v13 }
 0x786   : > { %v2495_v11 = vmax.f32 %v2493_v19, 0.0 }
 0x788   : > { %v2497_v54 = vrot.slane %v2495_v11, 1 }
 0x78a   : > { %v2499_v17 = vmax.f32 %v2495_v11, %v2497_v54 }
 0x78c   : > { %2858 = vmatpush.msk.msrb.mxu2 %vm2101_vm11, %v2499_v17  ;;  %vm2651_vm11 = vcmask 73728  }
 0x78d   : > { %2859 = vmatmul.msk.f32.vlgmr.msrb.gmra.mxu2 %vm2500_vm14, %v2855_v61 }
 0x78e   : > { %2554 = vmatpush.msra.mxu2 %v2541_v46 }
 0x790   : > { %2555 = vmatpush.msra.mxu2 %v2540_v56 }
 0x792   : > { %2556 = vmatpush.msra.mxu2 %v2539_v12 }
 0x794   : > { %2557 = vmatpush.msra.mxu2 %v2538_v60 }
 0x796   : > { %2558 = vmatpush.msra.mxu2 %v2537_v2 }
 0x798   : > { %2559 = vmatpush.msra.mxu2 %v2536_v50 }
 0x79a   : > { %2560 = vmatpush.msra.mxu2 %v2535_v15 }
 0x79c   : > { %2561 = vmatpush.msra.mxu2 %v2534_v7 }
 0x79e   : > { %2863 = vmatpush.msk.msrb.mxu2 %vm2627_vm15, %v2621_v24 }
 0x7a0   : > { %2635 = vmatpush.msrb.mxu2 %v2620_v25 }
 0x7a2   : > { %2636 = vmatpush.msrb.mxu2 %v2619_v26 }
 0x7a4   : > { %2637 = vmatpush.msrb.mxu2 %v2618_v27 }
 0x7a6   : > { %2638 = vmatpush.msrb.mxu2 %v2617_v32 }
 0x7a8   : > { %2639 = vmatpush.msrb.mxu2 %v2616_v35 }
 0x7aa   : > { %2640 = vmatpush.msrb.mxu2 %v2615_v36 }
 0x7ac   : > { %2641 = vmatpush.msrb.mxu2 %v2614_v40 }
 0x7ae   : > { %2642 = vmatpush.msrb.mxu2 %v2613_v39 }
 0x7b0   : > { %2643 = vmatpush.msrb.mxu2 %v2612_v43 }
 0x7b2   : > { %2644 = vmatpush.msrb.mxu2 %v2611_v37 }
 0x7b4   : > { %2645 = vmatpush.msrb.mxu2 %v2610_v51 }
 0x7b6   : > { %2646 = vmatpush.msrb.mxu2 %v2609_v53 }
 0x810   : > { %v2523_v49 = vpop.f32.mrf.mxu2 }
 0x811   : > { %v2543_v21 = vrot.slane %v2523_v49, 1  ;;  %2861 = vmatmul.msk.f32.vlgmr.msra.gmra.mxu3 %vm1743_vm8, %v2523_v49 }
 0x813   : > { %2860 = vmatmul.msk.f32.vlgmr.msra.gmra.mxu2 %vm1743_vm8, %v2543_v21 }
 0x894   : > { %v2585_v33 = vpop.f32.mrf.mxu3 }
 0x896   : > { %v2563_v48 = vpop.f32.mrf.mxu2 }
 0x897   : > { %v2586_v58 = vadd.f32 %v2585_v33, %v2563_v48 }
 0x899   : > { %v2589_v61 = vadd.f32 %v2588_v59, %v2586_v58 }
 0x89b   : > { %v2862_v62 = vmul.f32 -1.442695, %v2589_v61 }
 0x89d   : > { %2930 = vpow2.f32 %v2862_v62 }
 0x8a3   : > { %v2931_v16 = vpop.eup %2930 }
 0x8a4   : > { %v2593_v8 = vadd.f32 1.0, %v2931_v16 }
 0x8a6   : > { %2932 = vrcp.f32 %v2593_v8  ;;  %v2605_v34 = vand.u32 2147483648, %v2593_v8  ;;  %v2603_v18 = vand.u32 2147483647, %v2593_v8  ;;  %vm2599_vm1 = vweird.f32 %v2593_v8 }
 0x8a8   : > { %v2606_v9 = vor.u32 1.1754944e-38, %v2605_v34  ;;  %vm2604_vm10 = vcmp.eq.f32.partialorder %v2603_v18, 8.507059e+37 }
 0x8ac   : > { %v2933_v31 = vpop.eup %2932 }
 0x8ad   : > { %v2595_v52 = vmul.f32 %v2933_v31, %v2593_v8  ;;  %vm2600_vm0 = vweird.f32 %v2933_v31 }
 0x8ae   : > { %vm2601_vm8 = vmor %vm2599_vm1, %vm2600_vm0 }
 0x8af   : > { %v2596_v42 = vsub.f32 1.0, %v2595_v52 }
 0x8b1   : > { %v2597_v28 = vmul.f32 %v2933_v31, %v2596_v42 }
 0x8b3   : > { %v2598_v63 = vadd.f32 %v2933_v31, %v2597_v28 }
 0x8b5   : > { %v2602_v41 = vsel %vm2601_vm8, %v2933_v31, %v2598_v63 }
 0x8b6   : > { %v2607_v30 = vsel %vm2604_vm10, %v2606_v9, %v2602_v41 }
 0x8b7   : > { %2864 = vmatmul.msk.f32.vlgmr.msrb.gmra.mxu2 %vm2623_vm9, %v2607_v30 }
 0x93a   : > { %v2648_v0 = vpop.f32.mrf.mxu2 }
 0x93b   : > { %v2649_v1 = vadd.f32 %v2648_v0, %v2622_v38 }
 0x93d   : > { %v2652_v47 = vsel %vm2651_vm11, %v2649_v1, -inf }
 0x93e   : > { %2653 = vmax.xlane.f32.xlu0 %v2652_v47 }
 0x9b1   : > { %v2654_v3 = vpop.xlane.xlu0 %2653 }
 0x9b2   : > { %v2655_v4 = vsub.f32 %v2649_v1, %v2654_v3 }
 0x9b4   : > { %v2656_v5 = vmul.f32 1.442695, %v2655_v4 }
 0x9b6   : > { %2934 = vpow2.f32 %v2656_v5 }
 0x9bc   : > { %v2935_v6 = vpop.eup %2934 }
 0x9bd   : > { %v2658_v55 = vsel %vm2651_vm11, %v2935_v6, 0.0 }
 0x9be   : > { %2659 = vadd.xlane.f32.xlu0 %v2658_v55 }
 0xa31   : > { %v2660_v23 = vpop.xlane.xlu0 %2659 }
 0xa32   : > { %2936 = vrcp.f32 %v2660_v23  ;;  %v2672_v45 = vand.u32 2147483648, %v2660_v23  ;;  %v2670_v22 = vand.u32 2147483647, %v2660_v23  ;;  %vm2666_vm4 = vweird.f32 %v2660_v23 }
 0xa34   : > { %v2673_v19 = vor.u32 1.1754944e-38, %v2672_v45  ;;  %vm2671_vm6 = vcmp.eq.f32.partialorder %v2670_v22, 8.507059e+37 }
 0xa38   : > { %v2937_v29 = vpop.eup %2936 }
 0xa39   : > { %v2662_v57 = vmul.f32 %v2937_v29, %v2660_v23  ;;  %vm2667_vm12 = vweird.f32 %v2937_v29 }
 0xa3a   : > { %vm2668_vm5 = vmor %vm2666_vm4, %vm2667_vm12 }
 0xa3b   : > { %v2663_v10 = vsub.f32 1.0, %v2662_v57 }
 0xa3d   : > { %v2664_v44 = vmul.f32 %v2937_v29, %v2663_v10 }
 0xa3f   : > { %v2665_v13 = vadd.f32 %v2937_v29, %v2664_v44 }
 0xa41   : > { %v2669_v11 = vsel %vm2668_vm5, %v2937_v29, %v2665_v13 }
 0xa42   : > { %v2674_v54 = vsel %vm2671_vm6, %v2673_v19, %v2669_v11 }
 0xa43   : > { %v2675_v17 = vmul.f32 %v2935_v6, %v2674_v54 }
 0xa45   : > { %2676 = vst.msk [vmem:[%s783_s30] sm:$0x1] %vm2651_vm11, %v2675_v17 }
 0xa46   : > { %2965 = shalt.err (!%p2962_p3)
}
 0xa47   : > { %2868 = dma.vmem_to_hbm [thread:$0]  (%p3177_p5), %s2689_s28, 16, %s2691_s7, %s2678_s5  }
 0xa48 PF: > { %s4305_s6 = sld [smem:[#allocation8_spill]] }
 0xa49   : > { %s4306_s30 = sld [smem:[#allocation6_spill]] }
 0xa4e   : > { %p2874_p4 = scmp.ge.s32.totalorder %s4305_s6, 2 }
 0xa4f   : > { %s2702_s12 = sand.u32 1, %s4306_s30  }
 0xa50   : > { %p2871_p7 = pnand %p2874_p4, %p3181_p6  ;;  %s2703_s4 = scalar_lea.sflag [#allocation4], %s2702_s12 }
 0xa52   : > { %p2872_p8 = pneg %p2871_p7 }
 0xa54   : > { %2983 = dma.done.wait (%p2872_p8), %s2703_s4, 16  }
 0xa55   : > { %2985 = vsyncadd (%p2872_p8), %s2703_s4, 4294967280  ;;  %s4308_s28 = sld [smem:[#allocation9_spill]]  ;;  %s4311_s27 = smov %s2992_s3 }
 0xa56   : > { %s4309_s10 = sld [smem:[#allocation7_spill]] }
 0xa57   : > { %s4310_s7 = sld [smem:[#allocation10_spill]] }
 0xa5b   : > { %p36_p9 = scmp.ge.s32.totalorder %s4308_s28, 4  }
 0xa5c   : > { %s4312_s3 = smov %s4309_s10 }
 0xa5d   :  { %38 = sbr.rel (!%p36_p9) target bundleno = 17 (0x11), region = 159 }
 0xa62   :  { %2708 = vsyncpa [#allocation4], 1 }
 0xa63   :  { %2710 = vsyncpa [#allocation4 + $0x1], 1 }

</bundles_post_ra>
